<compile_context>
chip_gen: v7x
topology: tpu7x:2x2x1
jax: 0.10.0
libtpu: 0.0.40
codegen_flags: <defaults>
</compile_context>

<pallas_src>
import functools

import jax
import jax.numpy as jnp
from jax import lax
from jax.experimental import pallas as pl
from jax.experimental.pallas import tpu as pltpu


_FULL_VMEM = pl.BlockSpec(memory_space=pltpu.MemorySpace.VMEM)


# ----------------------------------------------------------------------------
# In-kernel helpers
# ----------------------------------------------------------------------------
def _dot(a, b):
    """(B, T, Cin) x (Cin, Cout) -> (B, T, Cout); bf16 MXU inputs, f32 accumulation."""
    return lax.dot_general(
        a.astype(jnp.bfloat16), b,
        dimension_numbers=(((2,), (0,)), ((), ())),
        preferred_element_type=jnp.float32,
    )


def _tap(pad_ref, k, t_out, stride):
    """Tap k of a kernel_size=3 conv, read from the zero-padded scratch ref."""
    if stride == 1:
        return pad_ref[:, k:k + t_out, :]
    return pad_ref[:, pl.ds(k, t_out, stride=stride), :]


def _conv3(pad_ref, w_ref, t_out, stride):
    """kernel_size=3 conv as 3 shifted matmuls from a padded VMEM scratch.

    TODO(synk): im2col the 3 taps into a single (To, 3*Cin) matmul once Mosaic
    lane-concat at odd channel counts (Cin=7) is validated; 3 dots kept for
    lowering robustness.
    """
    acc = _dot(_tap(pad_ref, 0, t_out, stride), w_ref[0])
    acc = acc + _dot(_tap(pad_ref, 1, t_out, stride), w_ref[1])
    acc = acc + _dot(_tap(pad_ref, 2, t_out, stride), w_ref[2])
    return acc


def _pad_into(pad_ref, x):
    """Write x into the (B, T+2, C) scratch; zero ONLY the two halo rows."""
    b, t, c = x.shape
    zrow = jnp.zeros((b, 1, c), pad_ref.dtype)
    pad_ref[:, 0:1, :] = zrow
    pad_ref[:, t + 1:t + 2, :] = zrow
    pad_ref[:, 1:t + 1, :] = x.astype(pad_ref.dtype)


# ----------------------------------------------------------------------------
# Fused whole-network kernel
# ----------------------------------------------------------------------------
def _fused_resnet_kernel(*refs, plan):
    n_in = plan["n_inputs"]
    in_refs = refs[:n_in]
    out_ref = refs[n_in]
    scratch_refs = refs[n_in + 1:]

    nxt = iter(in_refs).__next__
    nxt_s = iter(scratch_refs).__next__

    # ---- stem: Conv1d(k=3, s=1, p=1) + folded BN + ReLU ----
    x = nxt()[...]                                          # (B, T, Cin) f32
    w0, b0 = nxt(), nxt()
    pad0 = nxt_s()
    _pad_into(pad0, x)
    x = jnp.maximum(_conv3(pad0, w0, plan["stem_tout"], 1) + b0[...], 0.0)

    # ---- BasicBlocks (all intermediates stay in VMEM / vregs) ----
    for blk in plan["blocks"]:
        w1, b1, w2, b2 = nxt(), nxt(), nxt(), nxt()
        if blk["has_shortcut"]:
            wsc, bsc = nxt(), nxt()
        xpad, hpad = nxt_s(), nxt_s()
        stride, t_out = blk["stride"], blk["tout"]

        # conv1 + bn1 + relu (stride 1 or 2)
        _pad_into(xpad, x)
        h = jnp.maximum(_conv3(xpad, w1, t_out, stride) + b1[...], 0.0)

        # shortcut: 1x1 conv + bn (same stride) or identity
        if blk["has_shortcut"]:
            # x[stride*t] sits at padded row 1 + stride*t
            short = _dot(_tap(xpad, 1, t_out, stride), wsc[0]) + bsc[...]
        else:
            short = x

        # conv2 + bn2 + residual + relu (stride 1)
        # TODO(synk): replace this pad round-trip with pltpu.roll +/-1 sublane
        # shifts + boundary masks to drop the extra VMEM store/loads.
        _pad_into(hpad, h)
        x = jnp.maximum(_conv3(hpad, w2, t_out, 1) + b2[...] + short, 0.0)

    # ---- adaptive_avg_pool1d(., 1) -> flatten -> Linear ----
    lw, lb = nxt(), nxt()
    pooled = jnp.mean(x, axis=1)                            # (B, C) f32
    out = jnp.dot(pooled, lw[...], preferred_element_type=jnp.float32) + lb[...]
    out_ref[...] = out.astype(out_ref.dtype)


# ----------------------------------------------------------------------------
# Parameter prep (fold BN, cast weights to bf16, flatten) + forward wrapper
# ----------------------------------------------------------------------------
def _fold_conv(conv):
    """Fold BN scale into the conv weight; keep the shift as an f32 bias."""
    w = (conv["w"] * conv["scale"]).astype(jnp.bfloat16)     # (K, Cin, Cout)
    b = conv["shift"].reshape(1, 1, -1).astype(jnp.float32)  # (1, 1, Cout)
    return w, b


def prepare_resnet1d(params):
    """One-time prep: flat kernel-arg list + static block metadata."""
    args = []
    meta = {"blocks": []}

    w, b = _fold_conv(params["stem"])
    args += [w, b]
    meta["stem_cin"], meta["stem_cout"] = w.shape[1], w.shape[2]

    for layer in params["layers"]:
        for blk in layer:
            w1, b1 = _fold_conv(blk["conv1"])
            w2, b2 = _fold_conv(blk["conv2"])
            args += [w1, b1, w2, b2]
            has_sc = "shortcut" in blk
            if has_sc:
                wsc, bsc = _fold_conv(blk["shortcut"])
                args += [wsc, bsc]
            cin, cout, stride = w1.shape[1], w1.shape[2], blk["stride"]
            if not has_sc:
                # identity residual only valid when shapes match (BasicBlock rule)
                assert stride == 1 and cin == cout, (stride, cin, cout)
            meta["blocks"].append(
                {"stride": stride, "cin": cin, "cout": cout, "has_shortcut": has_sc})

    lw = params["linear_w"].astype(jnp.float32)
    lb = params["linear_b"].reshape(1, -1).astype(jnp.float32)
    args += [lw, lb]
    meta["out_size"] = lw.shape[1]
    return {"args": args, "meta": meta}


def resnet1d_forward(prepped, x_ncw):
    """x_ncw: (B, C_in, L) float32, matching the PyTorch Conv1d input layout."""
    x = jnp.transpose(x_ncw, (0, 2, 1)).astype(jnp.float32)   # -> (B, T, C)
    B, T, Cin = x.shape
    meta, args = prepped["meta"], prepped["args"]
    assert Cin == meta["stem_cin"], (Cin, meta["stem_cin"])

    # Static plan: time-length chain + per-conv padded VMEM scratch shapes.
    scratch_shapes = [pltpu.VMEM((B, T + 2, Cin), jnp.float32)]   # stem input pad
    plan_blocks = []
    t = T
    for bm in meta["blocks"]:
        tout = (t - 1) // bm["stride"] + 1                        # k=3, p=1
        scratch_shapes += [
            pltpu.VMEM((B, t + 2, bm["cin"]), jnp.float32),       # conv1/shortcut input
            pltpu.VMEM((B, tout + 2, bm["cout"]), jnp.float32),   # conv2 input
        ]
        plan_blocks.append({"stride": bm["stride"], "tout": tout,
                            "has_shortcut": bm["has_shortcut"]})
        t = tout

    plan = {"n_inputs": 1 + len(args), "stem_tout": T, "blocks": tuple(plan_blocks)}
    kernel = functools.partial(_fused_resnet_kernel, plan=plan)

    return pl.pallas_call(
        kernel,
        out_shape=jax.ShapeDtypeStruct((B, meta["out_size"]), jnp.float32),
        in_specs=[_FULL_VMEM] * (1 + len(args)),
        out_specs=_FULL_VMEM,
        scratch_shapes=scratch_shapes,
    )(x, *args)


# ----------------------------------------------------------------------------
# Model parameter init (matches the PyTorch module's structure, eval-mode BN)
# ----------------------------------------------------------------------------
def _conv_bn_params(key, k, cin, cout):
    kw, kg, kb, km, kv = jax.random.split(key, 5)
    w = jax.random.normal(kw, (k, cin, cout), jnp.float32) * (k * cin) ** -0.5
    gamma = 1.0 + 0.1 * jax.random.normal(kg, (cout,), jnp.float32)
    beta = 0.1 * jax.random.normal(kb, (cout,), jnp.float32)
    mean = 0.1 * jax.random.normal(km, (cout,), jnp.float32)
    var = jnp.abs(jax.random.normal(kv, (cout,), jnp.float32)) + 0.5
    scale = gamma / jnp.sqrt(var + 1e-5)
    shift = beta - mean * scale
    return {"w": w, "scale": scale, "shift": shift}


def init_resnet1d_params(key, *, input_dim, planes, num_blocks, out_size):
    params = {}
    key, k0 = jax.random.split(key)
    params["stem"] = _conv_bn_params(k0, 3, input_dim, planes)

    in_planes = planes
    layers = []
    for nb, mult, stride0 in zip(num_blocks, (1, 2, 4, 8), (1, 2, 2, 2)):
        out_planes = planes * mult
        strides = [stride0] + [1] * (nb - 1)
        blocks = []
        for s in strides:
            key, k1, k2, k3 = jax.random.split(key, 4)
            blk = {
                "conv1": _conv_bn_params(k1, 3, in_planes, out_planes),
                "conv2": _conv_bn_params(k2, 3, out_planes, out_planes),
                "stride": s,
            }
            if s != 1 or in_planes != out_planes:
                blk["shortcut"] = _conv_bn_params(k3, 1, in_planes, out_planes)
            blocks.append(blk)
            in_planes = out_planes
        layers.append(blocks)
    params["layers"] = layers

    key, kw, kb = jax.random.split(key, 3)
    params["linear_w"] = (
        jax.random.normal(kw, (in_planes, out_size), jnp.float32) * in_planes ** -0.5
    )
    params["linear_b"] = 0.1 * jax.random.normal(kb, (out_size,), jnp.float32)
    return params


# ----------------------------------------------------------------------------
# Pure-JAX reference (independent check via lax.conv_general_dilated; uses the
# same folded bf16 weights / f32 accumulation so the comparison stays tight)
# ----------------------------------------------------------------------------
def _ref_conv_bn(x, conv, *, stride, relu, residual=None):
    w = (conv["w"] * conv["scale"]).astype(jnp.bfloat16)
    K = w.shape[0]
    pad = (K - 1) // 2
    y = lax.conv_general_dilated(
        x.astype(jnp.bfloat16), w, window_strides=(stride,), padding=[(pad, pad)],
        dimension_numbers=("NHC", "HIO", "NHC"),
        preferred_element_type=jnp.float32,
    )
    y = y + conv["shift"].reshape(1, 1, -1)
    if residual is not None:
        y = y + residual
    if relu:
        y = jnp.maximum(y, 0.0)
    return y


def _ref_forward(params, x_ncw):
    x = jnp.transpose(x_ncw, (0, 2, 1)).astype(jnp.float32)
    out = _ref_conv_bn(x, params["stem"], stride=1, relu=True)
    for layer in params["layers"]:
        for blk in layer:
            s = blk["stride"]
            o = _ref_conv_bn(out, blk["conv1"], stride=s, relu=True)
            if "shortcut" in blk:
                short = _ref_conv_bn(out, blk["shortcut"], stride=s, relu=False)
            else:
                short = out
            out = _ref_conv_bn(o, blk["conv2"], stride=1, relu=True, residual=short)
    pooled = jnp.mean(out, axis=1)
    return pooled @ params["linear_w"] + params["linear_b"]


# ----------------------------------------------------------------------------
if __name__ == "__main__":
    # Small shapes consistent with the module: batch=2, input_dim=7, seq=16,
    # planes=8, num_blocks=[1,1,1,1] (BasicBlock), out_size=16.
    B, INPUT_DIM, T = 2, 7, 16
    PLANES, OUT_SIZE = 8, 16
    NUM_BLOCKS = [1, 1, 1, 1]

    key = jax.random.PRNGKey(0)
    key, kx, kp = jax.random.split(key, 3)
    x = jax.random.normal(kx, (B, INPUT_DIM, T), jnp.float32)   # PyTorch NCW layout
    params = init_resnet1d_params(
        kp, input_dim=INPUT_DIM, planes=PLANES, num_blocks=NUM_BLOCKS, out_size=OUT_SIZE
    )

    prepped = prepare_resnet1d(params)
    out = jax.block_until_ready(resnet1d_forward(prepped, x))
    ref = jax.block_until_ready(_ref_forward(params, x))

    assert out.shape == (B, OUT_SIZE), out.shape
    # bf16 MXU inputs on both paths (f32 accumulation); 2e-3 covers accumulation-order noise.
    if not jnp.allclose(out, ref, rtol=2e-3, atol=2e-3):
        raise AssertionError("Pallas output does not match JAX reference")

    print("KERNEL_OK")
</pallas_src>

<mosaic_0001>
module attributes {stable_mosaic.version = 11 : i64} {
  func.func @_fused_resnet_kernel(%arg0: memref<2x16x7xf32, #tpu.memory_space<vmem>>, %arg1: memref<3x7x8xbf16, #tpu.memory_space<vmem>>, %arg2: memref<1x1x8xf32, #tpu.memory_space<vmem>>, %arg3: memref<3x8x8xbf16, #tpu.memory_space<vmem>>, %arg4: memref<1x1x8xf32, #tpu.memory_space<vmem>>, %arg5: memref<3x8x8xbf16, #tpu.memory_space<vmem>>, %arg6: memref<1x1x8xf32, #tpu.memory_space<vmem>>, %arg7: memref<3x8x16xbf16, #tpu.memory_space<vmem>>, %arg8: memref<1x1x16xf32, #tpu.memory_space<vmem>>, %arg9: memref<3x16x16xbf16, #tpu.memory_space<vmem>>, %arg10: memref<1x1x16xf32, #tpu.memory_space<vmem>>, %arg11: memref<1x8x16xbf16, #tpu.memory_space<vmem>>, %arg12: memref<1x1x16xf32, #tpu.memory_space<vmem>>, %arg13: memref<3x16x32xbf16, #tpu.memory_space<vmem>>, %arg14: memref<1x1x32xf32, #tpu.memory_space<vmem>>, %arg15: memref<3x32x32xbf16, #tpu.memory_space<vmem>>, %arg16: memref<1x1x32xf32, #tpu.memory_space<vmem>>, %arg17: memref<1x16x32xbf16, #tpu.memory_space<vmem>>, %arg18: memref<1x1x32xf32, #tpu.memory_space<vmem>>, %arg19: memref<3x32x64xbf16, #tpu.memory_space<vmem>>, %arg20: memref<1x1x64xf32, #tpu.memory_space<vmem>>, %arg21: memref<3x64x64xbf16, #tpu.memory_space<vmem>>, %arg22: memref<1x1x64xf32, #tpu.memory_space<vmem>>, %arg23: memref<1x32x64xbf16, #tpu.memory_space<vmem>>, %arg24: memref<1x1x64xf32, #tpu.memory_space<vmem>>, %arg25: memref<64x16xf32, #tpu.memory_space<vmem>>, %arg26: memref<1x16xf32, #tpu.memory_space<vmem>>, %arg27: memref<2x16xf32, #tpu.memory_space<vmem>>, %arg28: memref<2x18x7xf32, #tpu.memory_space<vmem>>, %arg29: memref<2x18x8xf32, #tpu.memory_space<vmem>>, %arg30: memref<2x18x8xf32, #tpu.memory_space<vmem>>, %arg31: memref<2x18x8xf32, #tpu.memory_space<vmem>>, %arg32: memref<2x10x16xf32, #tpu.memory_space<vmem>>, %arg33: memref<2x10x16xf32, #tpu.memory_space<vmem>>, %arg34: memref<2x6x32xf32, #tpu.memory_space<vmem>>, %arg35: memref<2x6x32xf32, #tpu.memory_space<vmem>>, %arg36: memref<2x4x64xf32, #tpu.memory_space<vmem>>) attributes {dimension_semantics = [], scalar_prefetch = 0 : i64, scratch_operands = 9 : i64, tpu.core_type = #tpu.core_type<tc>} {
    %c0 = arith.constant 0 : index
    %c0_0 = arith.constant 0 : index
    %c0_1 = arith.constant 0 : index
    %0 = vector.load %arg0[%c0, %c0_0, %c0_1] : memref<2x16x7xf32, #tpu.memory_space<vmem>>, vector<2x16x7xf32>
    %cst = arith.constant 0.000000e+00 : f32
    %1 = vector.broadcast %cst : f32 to vector<2x1x7xf32>
    %c0_2 = arith.constant 0 : index
    %c0_3 = arith.constant 0 : index
    %c0_4 = arith.constant 0 : index
    %2 = vector.load %arg28[%c0_2, %c0_3, %c0_4] : memref<2x18x7xf32, #tpu.memory_space<vmem>>, vector<2x1x7xf32>
    tpu.vector_store %arg28[%c0_2, %c0_3, %c0_4], %1 {strides = array<i32>} : memref<2x18x7xf32, #tpu.memory_space<vmem>>, vector<2x1x7xf32>,
    %c0_5 = arith.constant 0 : index
    %c17 = arith.constant 17 : index
    %c0_6 = arith.constant 0 : index
    %3 = vector.load %arg28[%c0_5, %c17, %c0_6] : memref<2x18x7xf32, #tpu.memory_space<vmem>>, vector<2x1x7xf32>
    tpu.vector_store %arg28[%c0_5, %c17, %c0_6], %1 {strides = array<i32>} : memref<2x18x7xf32, #tpu.memory_space<vmem>>, vector<2x1x7xf32>,
    %c0_7 = arith.constant 0 : index
    %c1 = arith.constant 1 : index
    %c0_8 = arith.constant 0 : index
    %4 = vector.load %arg28[%c0_7, %c1, %c0_8] : memref<2x18x7xf32, #tpu.memory_space<vmem>>, vector<2x16x7xf32>
    tpu.vector_store %arg28[%c0_7, %c1, %c0_8], %0 {strides = array<i32>} : memref<2x18x7xf32, #tpu.memory_space<vmem>>, vector<2x16x7xf32>,
    %c0_9 = arith.constant 0 : index
    %c0_10 = arith.constant 0 : index
    %c0_11 = arith.constant 0 : index
    %5 = vector.load %arg28[%c0_9, %c0_10, %c0_11] : memref<2x18x7xf32, #tpu.memory_space<vmem>>, vector<2x16x7xf32>
    %c0_12 = arith.constant 0 : index
    %c0_13 = arith.constant 0 : index
    %c0_14 = arith.constant 0 : index
    %6 = vector.load %arg1[%c0_12, %c0_13, %c0_14] : memref<3x7x8xbf16, #tpu.memory_space<vmem>>, vector<1x7x8xbf16>
    %7 = vector.shape_cast %6 : vector<1x7x8xbf16> to vector<7x8xbf16>
    %8 = arith.truncf %5 : vector<2x16x7xf32> to vector<2x16x7xbf16>
    %cst_15 = arith.constant dense<0.000000e+00> : vector<2x16x8xf32>
    %9 = tpu.matmul %8, %7, %cst_15 {dimension_numbers = #tpu.dot_dimension_numbers<[2], [0], [0, 1], [1], [0, 0, 0, 1, 1, 1], [], []>} : vector<2x16x7xbf16>, vector<7x8xbf16>, vector<2x16x8xf32> -> vector<2x16x8xf32>
    %c0_16 = arith.constant 0 : index
    %c1_17 = arith.constant 1 : index
    %c0_18 = arith.constant 0 : index
    %10 = vector.load %arg28[%c0_16, %c1_17, %c0_18] : memref<2x18x7xf32, #tpu.memory_space<vmem>>, vector<2x16x7xf32>
    %c1_19 = arith.constant 1 : index
    %c0_20 = arith.constant 0 : index
    %c0_21 = arith.constant 0 : index
    %11 = vector.load %arg1[%c1_19, %c0_20, %c0_21] : memref<3x7x8xbf16, #tpu.memory_space<vmem>>, vector<1x7x8xbf16>
    %12 = vector.shape_cast %11 : vector<1x7x8xbf16> to vector<7x8xbf16>
    %13 = arith.truncf %10 : vector<2x16x7xf32> to vector<2x16x7xbf16>
    %cst_22 = arith.constant dense<0.000000e+00> : vector<2x16x8xf32>
    %14 = tpu.matmul %13, %12, %cst_22 {dimension_numbers = #tpu.dot_dimension_numbers<[2], [0], [0, 1], [1], [0, 0, 0, 1, 1, 1], [], []>} : vector<2x16x7xbf16>, vector<7x8xbf16>, vector<2x16x8xf32> -> vector<2x16x8xf32>
    %15 = arith.addf %9, %14 : vector<2x16x8xf32>
    %c0_23 = arith.constant 0 : index
    %c2 = arith.constant 2 : index
    %c0_24 = arith.constant 0 : index
    %16 = vector.load %arg28[%c0_23, %c2, %c0_24] : memref<2x18x7xf32, #tpu.memory_space<vmem>>, vector<2x16x7xf32>
    %c2_25 = arith.constant 2 : index
    %c0_26 = arith.constant 0 : index
    %c0_27 = arith.constant 0 : index
    %17 = vector.load %arg1[%c2_25, %c0_26, %c0_27] : memref<3x7x8xbf16, #tpu.memory_space<vmem>>, vector<1x7x8xbf16>
    %18 = vector.shape_cast %17 : vector<1x7x8xbf16> to vector<7x8xbf16>
    %19 = arith.truncf %16 : vector<2x16x7xf32> to vector<2x16x7xbf16>
    %cst_28 = arith.constant dense<0.000000e+00> : vector<2x16x8xf32>
    %20 = tpu.matmul %19, %18, %cst_28 {dimension_numbers = #tpu.dot_dimension_numbers<[2], [0], [0, 1], [1], [0, 0, 0, 1, 1, 1], [], []>} : vector<2x16x7xbf16>, vector<7x8xbf16>, vector<2x16x8xf32> -> vector<2x16x8xf32>
    %21 = arith.addf %15, %20 : vector<2x16x8xf32>
    %c0_29 = arith.constant 0 : index
    %c0_30 = arith.constant 0 : index
    %c0_31 = arith.constant 0 : index
    %22 = vector.load %arg2[%c0_29, %c0_30, %c0_31] : memref<1x1x8xf32, #tpu.memory_space<vmem>>, vector<1x1x8xf32>
    %23 = vector.broadcast %22 : vector<1x1x8xf32> to vector<2x16x8xf32>
    %24 = arith.addf %21, %23 : vector<2x16x8xf32>
    %cst_32 = arith.constant 0.000000e+00 : f32
    %25 = vector.broadcast %cst_32 : f32 to vector<2x16x8xf32>
    %26 = arith.maximumf %24, %25 : vector<2x16x8xf32>
    %cst_33 = arith.constant 0.000000e+00 : f32
    %27 = vector.broadcast %cst_33 : f32 to vector<2x1x8xf32>
    %c0_34 = arith.constant 0 : index
    %c0_35 = arith.constant 0 : index
    %c0_36 = arith.constant 0 : index
    %28 = vector.load %arg29[%c0_34, %c0_35, %c0_36] : memref<2x18x8xf32, #tpu.memory_space<vmem>>, vector<2x1x8xf32>
    tpu.vector_store %arg29[%c0_34, %c0_35, %c0_36], %27 {strides = array<i32>} : memref<2x18x8xf32, #tpu.memory_space<vmem>>, vector<2x1x8xf32>,
    %c0_37 = arith.constant 0 : index
    %c17_38 = arith.constant 17 : index
    %c0_39 = arith.constant 0 : index
    %29 = vector.load %arg29[%c0_37, %c17_38, %c0_39] : memref<2x18x8xf32, #tpu.memory_space<vmem>>, vector<2x1x8xf32>
    tpu.vector_store %arg29[%c0_37, %c17_38, %c0_39], %27 {strides = array<i32>} : memref<2x18x8xf32, #tpu.memory_space<vmem>>, vector<2x1x8xf32>,
    %c0_40 = arith.constant 0 : index
    %c1_41 = arith.constant 1 : index
    %c0_42 = arith.constant 0 : index
    %30 = vector.load %arg29[%c0_40, %c1_41, %c0_42] : memref<2x18x8xf32, #tpu.memory_space<vmem>>, vector<2x16x8xf32>
    tpu.vector_store %arg29[%c0_40, %c1_41, %c0_42], %26 {strides = array<i32>} : memref<2x18x8xf32, #tpu.memory_space<vmem>>, vector<2x16x8xf32>,
    %c0_43 = arith.constant 0 : index
    %c0_44 = arith.constant 0 : index
    %c0_45 = arith.constant 0 : index
    %31 = vector.load %arg29[%c0_43, %c0_44, %c0_45] : memref<2x18x8xf32, #tpu.memory_space<vmem>>, vector<2x16x8xf32>
    %c0_46 = arith.constant 0 : index
    %c0_47 = arith.constant 0 : index
    %c0_48 = arith.constant 0 : index
    %32 = vector.load %arg3[%c0_46, %c0_47, %c0_48] : memref<3x8x8xbf16, #tpu.memory_space<vmem>>, vector<1x8x8xbf16>
    %33 = vector.shape_cast %32 : vector<1x8x8xbf16> to vector<8x8xbf16>
    %34 = arith.truncf %31 : vector<2x16x8xf32> to vector<2x16x8xbf16>
    %cst_49 = arith.constant dense<0.000000e+00> : vector<2x16x8xf32>
    %35 = tpu.matmul %34, %33, %cst_49 {dimension_numbers = #tpu.dot_dimension_numbers<[2], [0], [0, 1], [1], [0, 0, 0, 1, 1, 1], [], []>} : vector<2x16x8xbf16>, vector<8x8xbf16>, vector<2x16x8xf32> -> vector<2x16x8xf32>
    %c0_50 = arith.constant 0 : index
    %c1_51 = arith.constant 1 : index
    %c0_52 = arith.constant 0 : index
    %36 = vector.load %arg29[%c0_50, %c1_51, %c0_52] : memref<2x18x8xf32, #tpu.memory_space<vmem>>, vector<2x16x8xf32>
    %c1_53 = arith.constant 1 : index
    %c0_54 = arith.constant 0 : index
    %c0_55 = arith.constant 0 : index
    %37 = vector.load %arg3[%c1_53, %c0_54, %c0_55] : memref<3x8x8xbf16, #tpu.memory_space<vmem>>, vector<1x8x8xbf16>
    %38 = vector.shape_cast %37 : vector<1x8x8xbf16> to vector<8x8xbf16>
    %39 = arith.truncf %36 : vector<2x16x8xf32> to vector<2x16x8xbf16>
    %cst_56 = arith.constant dense<0.000000e+00> : vector<2x16x8xf32>
    %40 = tpu.matmul %39, %38, %cst_56 {dimension_numbers = #tpu.dot_dimension_numbers<[2], [0], [0, 1], [1], [0, 0, 0, 1, 1, 1], [], []>} : vector<2x16x8xbf16>, vector<8x8xbf16>, vector<2x16x8xf32> -> vector<2x16x8xf32>
    %41 = arith.addf %35, %40 : vector<2x16x8xf32>
    %c0_57 = arith.constant 0 : index
    %c2_58 = arith.constant 2 : index
    %c0_59 = arith.constant 0 : index
    %42 = vector.load %arg29[%c0_57, %c2_58, %c0_59] : memref<2x18x8xf32, #tpu.memory_space<vmem>>, vector<2x16x8xf32>
    %c2_60 = arith.constant 2 : index
    %c0_61 = arith.constant 0 : index
    %c0_62 = arith.constant 0 : index
    %43 = vector.load %arg3[%c2_60, %c0_61, %c0_62] : memref<3x8x8xbf16, #tpu.memory_space<vmem>>, vector<1x8x8xbf16>
    %44 = vector.shape_cast %43 : vector<1x8x8xbf16> to vector<8x8xbf16>
    %45 = arith.truncf %42 : vector<2x16x8xf32> to vector<2x16x8xbf16>
    %cst_63 = arith.constant dense<0.000000e+00> : vector<2x16x8xf32>
    %46 = tpu.matmul %45, %44, %cst_63 {dimension_numbers = #tpu.dot_dimension_numbers<[2], [0], [0, 1], [1], [0, 0, 0, 1, 1, 1], [], []>} : vector<2x16x8xbf16>, vector<8x8xbf16>, vector<2x16x8xf32> -> vector<2x16x8xf32>
    %47 = arith.addf %41, %46 : vector<2x16x8xf32>
    %c0_64 = arith.constant 0 : index
    %c0_65 = arith.constant 0 : index
    %c0_66 = arith.constant 0 : index
    %48 = vector.load %arg4[%c0_64, %c0_65, %c0_66] : memref<1x1x8xf32, #tpu.memory_space<vmem>>, vector<1x1x8xf32>
    %49 = vector.broadcast %48 : vector<1x1x8xf32> to vector<2x16x8xf32>
    %50 = arith.addf %47, %49 : vector<2x16x8xf32>
    %cst_67 = arith.constant 0.000000e+00 : f32
    %51 = vector.broadcast %cst_67 : f32 to vector<2x16x8xf32>
    %52 = arith.maximumf %50, %51 : vector<2x16x8xf32>
    %cst_68 = arith.constant 0.000000e+00 : f32
    %53 = vector.broadcast %cst_68 : f32 to vector<2x1x8xf32>
    %c0_69 = arith.constant 0 : index
    %c0_70 = arith.constant 0 : index
    %c0_71 = arith.constant 0 : index
    %54 = vector.load %arg30[%c0_69, %c0_70, %c0_71] : memref<2x18x8xf32, #tpu.memory_space<vmem>>, vector<2x1x8xf32>
    tpu.vector_store %arg30[%c0_69, %c0_70, %c0_71], %53 {strides = array<i32>} : memref<2x18x8xf32, #tpu.memory_space<vmem>>, vector<2x1x8xf32>,
    %c0_72 = arith.constant 0 : index
    %c17_73 = arith.constant 17 : index
    %c0_74 = arith.constant 0 : index
    %55 = vector.load %arg30[%c0_72, %c17_73, %c0_74] : memref<2x18x8xf32, #tpu.memory_space<vmem>>, vector<2x1x8xf32>
    tpu.vector_store %arg30[%c0_72, %c17_73, %c0_74], %53 {strides = array<i32>} : memref<2x18x8xf32, #tpu.memory_space<vmem>>, vector<2x1x8xf32>,
    %c0_75 = arith.constant 0 : index
    %c1_76 = arith.constant 1 : index
    %c0_77 = arith.constant 0 : index
    %56 = vector.load %arg30[%c0_75, %c1_76, %c0_77] : memref<2x18x8xf32, #tpu.memory_space<vmem>>, vector<2x16x8xf32>
    tpu.vector_store %arg30[%c0_75, %c1_76, %c0_77], %52 {strides = array<i32>} : memref<2x18x8xf32, #tpu.memory_space<vmem>>, vector<2x16x8xf32>,
    %c0_78 = arith.constant 0 : index
    %c0_79 = arith.constant 0 : index
    %c0_80 = arith.constant 0 : index
    %57 = vector.load %arg30[%c0_78, %c0_79, %c0_80] : memref<2x18x8xf32, #tpu.memory_space<vmem>>, vector<2x16x8xf32>
    %c0_81 = arith.constant 0 : index
    %c0_82 = arith.constant 0 : index
    %c0_83 = arith.constant 0 : index
    %58 = vector.load %arg5[%c0_81, %c0_82, %c0_83] : memref<3x8x8xbf16, #tpu.memory_space<vmem>>, vector<1x8x8xbf16>
    %59 = vector.shape_cast %58 : vector<1x8x8xbf16> to vector<8x8xbf16>
    %60 = arith.truncf %57 : vector<2x16x8xf32> to vector<2x16x8xbf16>
    %cst_84 = arith.constant dense<0.000000e+00> : vector<2x16x8xf32>
    %61 = tpu.matmul %60, %59, %cst_84 {dimension_numbers = #tpu.dot_dimension_numbers<[2], [0], [0, 1], [1], [0, 0, 0, 1, 1, 1], [], []>} : vector<2x16x8xbf16>, vector<8x8xbf16>, vector<2x16x8xf32> -> vector<2x16x8xf32>
    %c0_85 = arith.constant 0 : index
    %c1_86 = arith.constant 1 : index
    %c0_87 = arith.constant 0 : index
    %62 = vector.load %arg30[%c0_85, %c1_86, %c0_87] : memref<2x18x8xf32, #tpu.memory_space<vmem>>, vector<2x16x8xf32>
    %c1_88 = arith.constant 1 : index
    %c0_89 = arith.constant 0 : index
    %c0_90 = arith.constant 0 : index
    %63 = vector.load %arg5[%c1_88, %c0_89, %c0_90] : memref<3x8x8xbf16, #tpu.memory_space<vmem>>, vector<1x8x8xbf16>
    %64 = vector.shape_cast %63 : vector<1x8x8xbf16> to vector<8x8xbf16>
    %65 = arith.truncf %62 : vector<2x16x8xf32> to vector<2x16x8xbf16>
    %cst_91 = arith.constant dense<0.000000e+00> : vector<2x16x8xf32>
    %66 = tpu.matmul %65, %64, %cst_91 {dimension_numbers = #tpu.dot_dimension_numbers<[2], [0], [0, 1], [1], [0, 0, 0, 1, 1, 1], [], []>} : vector<2x16x8xbf16>, vector<8x8xbf16>, vector<2x16x8xf32> -> vector<2x16x8xf32>
    %67 = arith.addf %61, %66 : vector<2x16x8xf32>
    %c0_92 = arith.constant 0 : index
    %c2_93 = arith.constant 2 : index
    %c0_94 = arith.constant 0 : index
    %68 = vector.load %arg30[%c0_92, %c2_93, %c0_94] : memref<2x18x8xf32, #tpu.memory_space<vmem>>, vector<2x16x8xf32>
    %c2_95 = arith.constant 2 : index
    %c0_96 = arith.constant 0 : index
    %c0_97 = arith.constant 0 : index
    %69 = vector.load %arg5[%c2_95, %c0_96, %c0_97] : memref<3x8x8xbf16, #tpu.memory_space<vmem>>, vector<1x8x8xbf16>
    %70 = vector.shape_cast %69 : vector<1x8x8xbf16> to vector<8x8xbf16>
    %71 = arith.truncf %68 : vector<2x16x8xf32> to vector<2x16x8xbf16>
    %cst_98 = arith.constant dense<0.000000e+00> : vector<2x16x8xf32>
    %72 = tpu.matmul %71, %70, %cst_98 {dimension_numbers = #tpu.dot_dimension_numbers<[2], [0], [0, 1], [1], [0, 0, 0, 1, 1, 1], [], []>} : vector<2x16x8xbf16>, vector<8x8xbf16>, vector<2x16x8xf32> -> vector<2x16x8xf32>
    %73 = arith.addf %67, %72 : vector<2x16x8xf32>
    %c0_99 = arith.constant 0 : index
    %c0_100 = arith.constant 0 : index
    %c0_101 = arith.constant 0 : index
    %74 = vector.load %arg6[%c0_99, %c0_100, %c0_101] : memref<1x1x8xf32, #tpu.memory_space<vmem>>, vector<1x1x8xf32>
    %75 = vector.broadcast %74 : vector<1x1x8xf32> to vector<2x16x8xf32>
    %76 = arith.addf %73, %75 : vector<2x16x8xf32>
    %77 = arith.addf %76, %26 : vector<2x16x8xf32>
    %cst_102 = arith.constant 0.000000e+00 : f32
    %78 = vector.broadcast %cst_102 : f32 to vector<2x16x8xf32>
    %79 = arith.maximumf %77, %78 : vector<2x16x8xf32>
    %cst_103 = arith.constant 0.000000e+00 : f32
    %80 = vector.broadcast %cst_103 : f32 to vector<2x1x8xf32>
    %c0_104 = arith.constant 0 : index
    %c0_105 = arith.constant 0 : index
    %c0_106 = arith.constant 0 : index
    %81 = vector.load %arg31[%c0_104, %c0_105, %c0_106] : memref<2x18x8xf32, #tpu.memory_space<vmem>>, vector<2x1x8xf32>
    tpu.vector_store %arg31[%c0_104, %c0_105, %c0_106], %80 {strides = array<i32>} : memref<2x18x8xf32, #tpu.memory_space<vmem>>, vector<2x1x8xf32>,
    %c0_107 = arith.constant 0 : index
    %c17_108 = arith.constant 17 : index
    %c0_109 = arith.constant 0 : index
    %82 = vector.load %arg31[%c0_107, %c17_108, %c0_109] : memref<2x18x8xf32, #tpu.memory_space<vmem>>, vector<2x1x8xf32>
    tpu.vector_store %arg31[%c0_107, %c17_108, %c0_109], %80 {strides = array<i32>} : memref<2x18x8xf32, #tpu.memory_space<vmem>>, vector<2x1x8xf32>,
    %c0_110 = arith.constant 0 : index
    %c1_111 = arith.constant 1 : index
    %c0_112 = arith.constant 0 : index
    %83 = vector.load %arg31[%c0_110, %c1_111, %c0_112] : memref<2x18x8xf32, #tpu.memory_space<vmem>>, vector<2x16x8xf32>
    tpu.vector_store %arg31[%c0_110, %c1_111, %c0_112], %79 {strides = array<i32>} : memref<2x18x8xf32, #tpu.memory_space<vmem>>, vector<2x16x8xf32>,
    %c0_113 = arith.constant 0 : index
    %c0_114 = arith.constant 0 : index
    %c0_115 = arith.constant 0 : index
    %84 = tpu.strided_load %arg31[%c0_113, %c0_114, %c0_115] {strides = array<i32: 1, 2, 1>} : memref<2x18x8xf32, #tpu.memory_space<vmem>>, vector<2x8x8xf32>
    %c0_116 = arith.constant 0 : index
    %c0_117 = arith.constant 0 : index
    %c0_118 = arith.constant 0 : index
    %85 = vector.load %arg7[%c0_116, %c0_117, %c0_118] : memref<3x8x16xbf16, #tpu.memory_space<vmem>>, vector<1x8x16xbf16>
    %86 = vector.shape_cast %85 : vector<1x8x16xbf16> to vector<8x16xbf16>
    %87 = arith.truncf %84 : vector<2x8x8xf32> to vector<2x8x8xbf16>
    %cst_119 = arith.constant dense<0.000000e+00> : vector<2x8x16xf32>
    %88 = tpu.matmul %87, %86, %cst_119 {dimension_numbers = #tpu.dot_dimension_numbers<[2], [0], [0, 1], [1], [0, 0, 0, 1, 1, 1], [], []>} : vector<2x8x8xbf16>, vector<8x16xbf16>, vector<2x8x16xf32> -> vector<2x8x16xf32>
    %c0_120 = arith.constant 0 : index
    %c1_121 = arith.constant 1 : index
    %c0_122 = arith.constant 0 : index
    %89 = tpu.strided_load %arg31[%c0_120, %c1_121, %c0_122] {strides = array<i32: 1, 2, 1>} : memref<2x18x8xf32, #tpu.memory_space<vmem>>, vector<2x8x8xf32>
    %c1_123 = arith.constant 1 : index
    %c0_124 = arith.constant 0 : index
    %c0_125 = arith.constant 0 : index
    %90 = vector.load %arg7[%c1_123, %c0_124, %c0_125] : memref<3x8x16xbf16, #tpu.memory_space<vmem>>, vector<1x8x16xbf16>
    %91 = vector.shape_cast %90 : vector<1x8x16xbf16> to vector<8x16xbf16>
    %92 = arith.truncf %89 : vector<2x8x8xf32> to vector<2x8x8xbf16>
    %cst_126 = arith.constant dense<0.000000e+00> : vector<2x8x16xf32>
    %93 = tpu.matmul %92, %91, %cst_126 {dimension_numbers = #tpu.dot_dimension_numbers<[2], [0], [0, 1], [1], [0, 0, 0, 1, 1, 1], [], []>} : vector<2x8x8xbf16>, vector<8x16xbf16>, vector<2x8x16xf32> -> vector<2x8x16xf32>
    %94 = arith.addf %88, %93 : vector<2x8x16xf32>
    %c0_127 = arith.constant 0 : index
    %c2_128 = arith.constant 2 : index
    %c0_129 = arith.constant 0 : index
    %95 = tpu.strided_load %arg31[%c0_127, %c2_128, %c0_129] {strides = array<i32: 1, 2, 1>} : memref<2x18x8xf32, #tpu.memory_space<vmem>>, vector<2x8x8xf32>
    %c2_130 = arith.constant 2 : index
    %c0_131 = arith.constant 0 : index
    %c0_132 = arith.constant 0 : index
    %96 = vector.load %arg7[%c2_130, %c0_131, %c0_132] : memref<3x8x16xbf16, #tpu.memory_space<vmem>>, vector<1x8x16xbf16>
    %97 = vector.shape_cast %96 : vector<1x8x16xbf16> to vector<8x16xbf16>
    %98 = arith.truncf %95 : vector<2x8x8xf32> to vector<2x8x8xbf16>
    %cst_133 = arith.constant dense<0.000000e+00> : vector<2x8x16xf32>
    %99 = tpu.matmul %98, %97, %cst_133 {dimension_numbers = #tpu.dot_dimension_numbers<[2], [0], [0, 1], [1], [0, 0, 0, 1, 1, 1], [], []>} : vector<2x8x8xbf16>, vector<8x16xbf16>, vector<2x8x16xf32> -> vector<2x8x16xf32>
    %100 = arith.addf %94, %99 : vector<2x8x16xf32>
    %c0_134 = arith.constant 0 : index
    %c0_135 = arith.constant 0 : index
    %c0_136 = arith.constant 0 : index
    %101 = vector.load %arg8[%c0_134, %c0_135, %c0_136] : memref<1x1x16xf32, #tpu.memory_space<vmem>>, vector<1x1x16xf32>
    %102 = vector.broadcast %101 : vector<1x1x16xf32> to vector<2x8x16xf32>
    %103 = arith.addf %100, %102 : vector<2x8x16xf32>
    %cst_137 = arith.constant 0.000000e+00 : f32
    %104 = vector.broadcast %cst_137 : f32 to vector<2x8x16xf32>
    %105 = arith.maximumf %103, %104 : vector<2x8x16xf32>
    %c0_138 = arith.constant 0 : index
    %c1_139 = arith.constant 1 : index
    %c0_140 = arith.constant 0 : index
    %106 = tpu.strided_load %arg31[%c0_138, %c1_139, %c0_140] {strides = array<i32: 1, 2, 1>} : memref<2x18x8xf32, #tpu.memory_space<vmem>>, vector<2x8x8xf32>
    %c0_141 = arith.constant 0 : index
    %c0_142 = arith.constant 0 : index
    %c0_143 = arith.constant 0 : index
    %107 = vector.load %arg11[%c0_141, %c0_142, %c0_143] : memref<1x8x16xbf16, #tpu.memory_space<vmem>>, vector<1x8x16xbf16>
    %108 = vector.shape_cast %107 : vector<1x8x16xbf16> to vector<8x16xbf16>
    %109 = arith.truncf %106 : vector<2x8x8xf32> to vector<2x8x8xbf16>
    %cst_144 = arith.constant dense<0.000000e+00> : vector<2x8x16xf32>
    %110 = tpu.matmul %109, %108, %cst_144 {dimension_numbers = #tpu.dot_dimension_numbers<[2], [0], [0, 1], [1], [0, 0, 0, 1, 1, 1], [], []>} : vector<2x8x8xbf16>, vector<8x16xbf16>, vector<2x8x16xf32> -> vector<2x8x16xf32>
    %c0_145 = arith.constant 0 : index
    %c0_146 = arith.constant 0 : index
    %c0_147 = arith.constant 0 : index
    %111 = vector.load %arg12[%c0_145, %c0_146, %c0_147] : memref<1x1x16xf32, #tpu.memory_space<vmem>>, vector<1x1x16xf32>
    %112 = vector.broadcast %111 : vector<1x1x16xf32> to vector<2x8x16xf32>
    %113 = arith.addf %110, %112 : vector<2x8x16xf32>
    %cst_148 = arith.constant 0.000000e+00 : f32
    %114 = vector.broadcast %cst_148 : f32 to vector<2x1x16xf32>
    %c0_149 = arith.constant 0 : index
    %c0_150 = arith.constant 0 : index
    %c0_151 = arith.constant 0 : index
    %115 = vector.load %arg32[%c0_149, %c0_150, %c0_151] : memref<2x10x16xf32, #tpu.memory_space<vmem>>, vector<2x1x16xf32>
    tpu.vector_store %arg32[%c0_149, %c0_150, %c0_151], %114 {strides = array<i32>} : memref<2x10x16xf32, #tpu.memory_space<vmem>>, vector<2x1x16xf32>,
    %c0_152 = arith.constant 0 : index
    %c9 = arith.constant 9 : index
    %c0_153 = arith.constant 0 : index
    %116 = vector.load %arg32[%c0_152, %c9, %c0_153] : memref<2x10x16xf32, #tpu.memory_space<vmem>>, vector<2x1x16xf32>
    tpu.vector_store %arg32[%c0_152, %c9, %c0_153], %114 {strides = array<i32>} : memref<2x10x16xf32, #tpu.memory_space<vmem>>, vector<2x1x16xf32>,
    %c0_154 = arith.constant 0 : index
    %c1_155 = arith.constant 1 : index
    %c0_156 = arith.constant 0 : index
    %117 = vector.load %arg32[%c0_154, %c1_155, %c0_156] : memref<2x10x16xf32, #tpu.memory_space<vmem>>, vector<2x8x16xf32>
    tpu.vector_store %arg32[%c0_154, %c1_155, %c0_156], %105 {strides = array<i32>} : memref<2x10x16xf32, #tpu.memory_space<vmem>>, vector<2x8x16xf32>,
    %c0_157 = arith.constant 0 : index
    %c0_158 = arith.constant 0 : index
    %c0_159 = arith.constant 0 : index
    %118 = vector.load %arg32[%c0_157, %c0_158, %c0_159] : memref<2x10x16xf32, #tpu.memory_space<vmem>>, vector<2x8x16xf32>
    %c0_160 = arith.constant 0 : index
    %c0_161 = arith.constant 0 : index
    %c0_162 = arith.constant 0 : index
    %119 = vector.load %arg9[%c0_160, %c0_161, %c0_162] : memref<3x16x16xbf16, #tpu.memory_space<vmem>>, vector<1x16x16xbf16>
    %120 = vector.shape_cast %119 : vector<1x16x16xbf16> to vector<16x16xbf16>
    %121 = arith.truncf %118 : vector<2x8x16xf32> to vector<2x8x16xbf16>
    %cst_163 = arith.constant dense<0.000000e+00> : vector<2x8x16xf32>
    %122 = tpu.matmul %121, %120, %cst_163 {dimension_numbers = #tpu.dot_dimension_numbers<[2], [0], [0, 1], [1], [0, 0, 0, 1, 1, 1], [], []>} : vector<2x8x16xbf16>, vector<16x16xbf16>, vector<2x8x16xf32> -> vector<2x8x16xf32>
    %c0_164 = arith.constant 0 : index
    %c1_165 = arith.constant 1 : index
    %c0_166 = arith.constant 0 : index
    %123 = vector.load %arg32[%c0_164, %c1_165, %c0_166] : memref<2x10x16xf32, #tpu.memory_space<vmem>>, vector<2x8x16xf32>
    %c1_167 = arith.constant 1 : index
    %c0_168 = arith.constant 0 : index
    %c0_169 = arith.constant 0 : index
    %124 = vector.load %arg9[%c1_167, %c0_168, %c0_169] : memref<3x16x16xbf16, #tpu.memory_space<vmem>>, vector<1x16x16xbf16>
    %125 = vector.shape_cast %124 : vector<1x16x16xbf16> to vector<16x16xbf16>
    %126 = arith.truncf %123 : vector<2x8x16xf32> to vector<2x8x16xbf16>
    %cst_170 = arith.constant dense<0.000000e+00> : vector<2x8x16xf32>
    %127 = tpu.matmul %126, %125, %cst_170 {dimension_numbers = #tpu.dot_dimension_numbers<[2], [0], [0, 1], [1], [0, 0, 0, 1, 1, 1], [], []>} : vector<2x8x16xbf16>, vector<16x16xbf16>, vector<2x8x16xf32> -> vector<2x8x16xf32>
    %128 = arith.addf %122, %127 : vector<2x8x16xf32>
    %c0_171 = arith.constant 0 : index
    %c2_172 = arith.constant 2 : index
    %c0_173 = arith.constant 0 : index
    %129 = vector.load %arg32[%c0_171, %c2_172, %c0_173] : memref<2x10x16xf32, #tpu.memory_space<vmem>>, vector<2x8x16xf32>
    %c2_174 = arith.constant 2 : index
    %c0_175 = arith.constant 0 : index
    %c0_176 = arith.constant 0 : index
    %130 = vector.load %arg9[%c2_174, %c0_175, %c0_176] : memref<3x16x16xbf16, #tpu.memory_space<vmem>>, vector<1x16x16xbf16>
    %131 = vector.shape_cast %130 : vector<1x16x16xbf16> to vector<16x16xbf16>
    %132 = arith.truncf %129 : vector<2x8x16xf32> to vector<2x8x16xbf16>
    %cst_177 = arith.constant dense<0.000000e+00> : vector<2x8x16xf32>
    %133 = tpu.matmul %132, %131, %cst_177 {dimension_numbers = #tpu.dot_dimension_numbers<[2], [0], [0, 1], [1], [0, 0, 0, 1, 1, 1], [], []>} : vector<2x8x16xbf16>, vector<16x16xbf16>, vector<2x8x16xf32> -> vector<2x8x16xf32>
    %134 = arith.addf %128, %133 : vector<2x8x16xf32>
    %c0_178 = arith.constant 0 : index
    %c0_179 = arith.constant 0 : index
    %c0_180 = arith.constant 0 : index
    %135 = vector.load %arg10[%c0_178, %c0_179, %c0_180] : memref<1x1x16xf32, #tpu.memory_space<vmem>>, vector<1x1x16xf32>
    %136 = vector.broadcast %135 : vector<1x1x16xf32> to vector<2x8x16xf32>
    %137 = arith.addf %134, %136 : vector<2x8x16xf32>
    %138 = arith.addf %137, %113 : vector<2x8x16xf32>
    %cst_181 = arith.constant 0.000000e+00 : f32
    %139 = vector.broadcast %cst_181 : f32 to vector<2x8x16xf32>
    %140 = arith.maximumf %138, %139 : vector<2x8x16xf32>
    %cst_182 = arith.constant 0.000000e+00 : f32
    %141 = vector.broadcast %cst_182 : f32 to vector<2x1x16xf32>
    %c0_183 = arith.constant 0 : index
    %c0_184 = arith.constant 0 : index
    %c0_185 = arith.constant 0 : index
    %142 = vector.load %arg33[%c0_183, %c0_184, %c0_185] : memref<2x10x16xf32, #tpu.memory_space<vmem>>, vector<2x1x16xf32>
    tpu.vector_store %arg33[%c0_183, %c0_184, %c0_185], %141 {strides = array<i32>} : memref<2x10x16xf32, #tpu.memory_space<vmem>>, vector<2x1x16xf32>,
    %c0_186 = arith.constant 0 : index
    %c9_187 = arith.constant 9 : index
    %c0_188 = arith.constant 0 : index
    %143 = vector.load %arg33[%c0_186, %c9_187, %c0_188] : memref<2x10x16xf32, #tpu.memory_space<vmem>>, vector<2x1x16xf32>
    tpu.vector_store %arg33[%c0_186, %c9_187, %c0_188], %141 {strides = array<i32>} : memref<2x10x16xf32, #tpu.memory_space<vmem>>, vector<2x1x16xf32>,
    %c0_189 = arith.constant 0 : index
    %c1_190 = arith.constant 1 : index
    %c0_191 = arith.constant 0 : index
    %144 = vector.load %arg33[%c0_189, %c1_190, %c0_191] : memref<2x10x16xf32, #tpu.memory_space<vmem>>, vector<2x8x16xf32>
    tpu.vector_store %arg33[%c0_189, %c1_190, %c0_191], %140 {strides = array<i32>} : memref<2x10x16xf32, #tpu.memory_space<vmem>>, vector<2x8x16xf32>,
    %c0_192 = arith.constant 0 : index
    %c0_193 = arith.constant 0 : index
    %c0_194 = arith.constant 0 : index
    %145 = tpu.strided_load %arg33[%c0_192, %c0_193, %c0_194] {strides = array<i32: 1, 2, 1>} : memref<2x10x16xf32, #tpu.memory_space<vmem>>, vector<2x4x16xf32>
    %c0_195 = arith.constant 0 : index
    %c0_196 = arith.constant 0 : index
    %c0_197 = arith.constant 0 : index
    %146 = vector.load %arg13[%c0_195, %c0_196, %c0_197] : memref<3x16x32xbf16, #tpu.memory_space<vmem>>, vector<1x16x32xbf16>
    %147 = vector.shape_cast %146 : vector<1x16x32xbf16> to vector<16x32xbf16>
    %148 = arith.truncf %145 : vector<2x4x16xf32> to vector<2x4x16xbf16>
    %cst_198 = arith.constant dense<0.000000e+00> : vector<2x4x32xf32>
    %149 = tpu.matmul %148, %147, %cst_198 {dimension_numbers = #tpu.dot_dimension_numbers<[2], [0], [0, 1], [1], [0, 0, 0, 1, 1, 1], [], []>} : vector<2x4x16xbf16>, vector<16x32xbf16>, vector<2x4x32xf32> -> vector<2x4x32xf32>
    %c0_199 = arith.constant 0 : index
    %c1_200 = arith.constant 1 : index
    %c0_201 = arith.constant 0 : index
    %150 = tpu.strided_load %arg33[%c0_199, %c1_200, %c0_201] {strides = array<i32: 1, 2, 1>} : memref<2x10x16xf32, #tpu.memory_space<vmem>>, vector<2x4x16xf32>
    %c1_202 = arith.constant 1 : index
    %c0_203 = arith.constant 0 : index
    %c0_204 = arith.constant 0 : index
    %151 = vector.load %arg13[%c1_202, %c0_203, %c0_204] : memref<3x16x32xbf16, #tpu.memory_space<vmem>>, vector<1x16x32xbf16>
    %152 = vector.shape_cast %151 : vector<1x16x32xbf16> to vector<16x32xbf16>
    %153 = arith.truncf %150 : vector<2x4x16xf32> to vector<2x4x16xbf16>
    %cst_205 = arith.constant dense<0.000000e+00> : vector<2x4x32xf32>
    %154 = tpu.matmul %153, %152, %cst_205 {dimension_numbers = #tpu.dot_dimension_numbers<[2], [0], [0, 1], [1], [0, 0, 0, 1, 1, 1], [], []>} : vector<2x4x16xbf16>, vector<16x32xbf16>, vector<2x4x32xf32> -> vector<2x4x32xf32>
    %155 = arith.addf %149, %154 : vector<2x4x32xf32>
    %c0_206 = arith.constant 0 : index
    %c2_207 = arith.constant 2 : index
    %c0_208 = arith.constant 0 : index
    %156 = tpu.strided_load %arg33[%c0_206, %c2_207, %c0_208] {strides = array<i32: 1, 2, 1>} : memref<2x10x16xf32, #tpu.memory_space<vmem>>, vector<2x4x16xf32>
    %c2_209 = arith.constant 2 : index
    %c0_210 = arith.constant 0 : index
    %c0_211 = arith.constant 0 : index
    %157 = vector.load %arg13[%c2_209, %c0_210, %c0_211] : memref<3x16x32xbf16, #tpu.memory_space<vmem>>, vector<1x16x32xbf16>
    %158 = vector.shape_cast %157 : vector<1x16x32xbf16> to vector<16x32xbf16>
    %159 = arith.truncf %156 : vector<2x4x16xf32> to vector<2x4x16xbf16>
    %cst_212 = arith.constant dense<0.000000e+00> : vector<2x4x32xf32>
    %160 = tpu.matmul %159, %158, %cst_212 {dimension_numbers = #tpu.dot_dimension_numbers<[2], [0], [0, 1], [1], [0, 0, 0, 1, 1, 1], [], []>} : vector<2x4x16xbf16>, vector<16x32xbf16>, vector<2x4x32xf32> -> vector<2x4x32xf32>
    %161 = arith.addf %155, %160 : vector<2x4x32xf32>
    %c0_213 = arith.constant 0 : index
    %c0_214 = arith.constant 0 : index
    %c0_215 = arith.constant 0 : index
    %162 = vector.load %arg14[%c0_213, %c0_214, %c0_215] : memref<1x1x32xf32, #tpu.memory_space<vmem>>, vector<1x1x32xf32>
    %163 = vector.broadcast %162 : vector<1x1x32xf32> to vector<2x4x32xf32>
    %164 = arith.addf %161, %163 : vector<2x4x32xf32>
    %cst_216 = arith.constant 0.000000e+00 : f32
    %165 = vector.broadcast %cst_216 : f32 to vector<2x4x32xf32>
    %166 = arith.maximumf %164, %165 : vector<2x4x32xf32>
    %c0_217 = arith.constant 0 : index
    %c1_218 = arith.constant 1 : index
    %c0_219 = arith.constant 0 : index
    %167 = tpu.strided_load %arg33[%c0_217, %c1_218, %c0_219] {strides = array<i32: 1, 2, 1>} : memref<2x10x16xf32, #tpu.memory_space<vmem>>, vector<2x4x16xf32>
    %c0_220 = arith.constant 0 : index
    %c0_221 = arith.constant 0 : index
    %c0_222 = arith.constant 0 : index
    %168 = vector.load %arg17[%c0_220, %c0_221, %c0_222] : memref<1x16x32xbf16, #tpu.memory_space<vmem>>, vector<1x16x32xbf16>
    %169 = vector.shape_cast %168 : vector<1x16x32xbf16> to vector<16x32xbf16>
    %170 = arith.truncf %167 : vector<2x4x16xf32> to vector<2x4x16xbf16>
    %cst_223 = arith.constant dense<0.000000e+00> : vector<2x4x32xf32>
    %171 = tpu.matmul %170, %169, %cst_223 {dimension_numbers = #tpu.dot_dimension_numbers<[2], [0], [0, 1], [1], [0, 0, 0, 1, 1, 1], [], []>} : vector<2x4x16xbf16>, vector<16x32xbf16>, vector<2x4x32xf32> -> vector<2x4x32xf32>
    %c0_224 = arith.constant 0 : index
    %c0_225 = arith.constant 0 : index
    %c0_226 = arith.constant 0 : index
    %172 = vector.load %arg18[%c0_224, %c0_225, %c0_226] : memref<1x1x32xf32, #tpu.memory_space<vmem>>, vector<1x1x32xf32>
    %173 = vector.broadcast %172 : vector<1x1x32xf32> to vector<2x4x32xf32>
    %174 = arith.addf %171, %173 : vector<2x4x32xf32>
    %cst_227 = arith.constant 0.000000e+00 : f32
    %175 = vector.broadcast %cst_227 : f32 to vector<2x1x32xf32>
    %c0_228 = arith.constant 0 : index
    %c0_229 = arith.constant 0 : index
    %c0_230 = arith.constant 0 : index
    %176 = vector.load %arg34[%c0_228, %c0_229, %c0_230] : memref<2x6x32xf32, #tpu.memory_space<vmem>>, vector<2x1x32xf32>
    tpu.vector_store %arg34[%c0_228, %c0_229, %c0_230], %175 {strides = array<i32>} : memref<2x6x32xf32, #tpu.memory_space<vmem>>, vector<2x1x32xf32>,
    %c0_231 = arith.constant 0 : index
    %c5 = arith.constant 5 : index
    %c0_232 = arith.constant 0 : index
    %177 = vector.load %arg34[%c0_231, %c5, %c0_232] : memref<2x6x32xf32, #tpu.memory_space<vmem>>, vector<2x1x32xf32>
    tpu.vector_store %arg34[%c0_231, %c5, %c0_232], %175 {strides = array<i32>} : memref<2x6x32xf32, #tpu.memory_space<vmem>>, vector<2x1x32xf32>,
    %c0_233 = arith.constant 0 : index
    %c1_234 = arith.constant 1 : index
    %c0_235 = arith.constant 0 : index
    %178 = vector.load %arg34[%c0_233, %c1_234, %c0_235] : memref<2x6x32xf32, #tpu.memory_space<vmem>>, vector<2x4x32xf32>
    tpu.vector_store %arg34[%c0_233, %c1_234, %c0_235], %166 {strides = array<i32>} : memref<2x6x32xf32, #tpu.memory_space<vmem>>, vector<2x4x32xf32>,
    %c0_236 = arith.constant 0 : index
    %c0_237 = arith.constant 0 : index
    %c0_238 = arith.constant 0 : index
    %179 = vector.load %arg34[%c0_236, %c0_237, %c0_238] : memref<2x6x32xf32, #tpu.memory_space<vmem>>, vector<2x4x32xf32>
    %c0_239 = arith.constant 0 : index
    %c0_240 = arith.constant 0 : index
    %c0_241 = arith.constant 0 : index
    %180 = vector.load %arg15[%c0_239, %c0_240, %c0_241] : memref<3x32x32xbf16, #tpu.memory_space<vmem>>, vector<1x32x32xbf16>
    %181 = vector.shape_cast %180 : vector<1x32x32xbf16> to vector<32x32xbf16>
    %182 = arith.truncf %179 : vector<2x4x32xf32> to vector<2x4x32xbf16>
    %cst_242 = arith.constant dense<0.000000e+00> : vector<2x4x32xf32>
    %183 = tpu.matmul %182, %181, %cst_242 {dimension_numbers = #tpu.dot_dimension_numbers<[2], [0], [0, 1], [1], [0, 0, 0, 1, 1, 1], [], []>} : vector<2x4x32xbf16>, vector<32x32xbf16>, vector<2x4x32xf32> -> vector<2x4x32xf32>
    %c0_243 = arith.constant 0 : index
    %c1_244 = arith.constant 1 : index
    %c0_245 = arith.constant 0 : index
    %184 = vector.load %arg34[%c0_243, %c1_244, %c0_245] : memref<2x6x32xf32, #tpu.memory_space<vmem>>, vector<2x4x32xf32>
    %c1_246 = arith.constant 1 : index
    %c0_247 = arith.constant 0 : index
    %c0_248 = arith.constant 0 : index
    %185 = vector.load %arg15[%c1_246, %c0_247, %c0_248] : memref<3x32x32xbf16, #tpu.memory_space<vmem>>, vector<1x32x32xbf16>
    %186 = vector.shape_cast %185 : vector<1x32x32xbf16> to vector<32x32xbf16>
    %187 = arith.truncf %184 : vector<2x4x32xf32> to vector<2x4x32xbf16>
    %cst_249 = arith.constant dense<0.000000e+00> : vector<2x4x32xf32>
    %188 = tpu.matmul %187, %186, %cst_249 {dimension_numbers = #tpu.dot_dimension_numbers<[2], [0], [0, 1], [1], [0, 0, 0, 1, 1, 1], [], []>} : vector<2x4x32xbf16>, vector<32x32xbf16>, vector<2x4x32xf32> -> vector<2x4x32xf32>
    %189 = arith.addf %183, %188 : vector<2x4x32xf32>
    %c0_250 = arith.constant 0 : index
    %c2_251 = arith.constant 2 : index
    %c0_252 = arith.constant 0 : index
    %190 = vector.load %arg34[%c0_250, %c2_251, %c0_252] : memref<2x6x32xf32, #tpu.memory_space<vmem>>, vector<2x4x32xf32>
    %c2_253 = arith.constant 2 : index
    %c0_254 = arith.constant 0 : index
    %c0_255 = arith.constant 0 : index
    %191 = vector.load %arg15[%c2_253, %c0_254, %c0_255] : memref<3x32x32xbf16, #tpu.memory_space<vmem>>, vector<1x32x32xbf16>
    %192 = vector.shape_cast %191 : vector<1x32x32xbf16> to vector<32x32xbf16>
    %193 = arith.truncf %190 : vector<2x4x32xf32> to vector<2x4x32xbf16>
    %cst_256 = arith.constant dense<0.000000e+00> : vector<2x4x32xf32>
    %194 = tpu.matmul %193, %192, %cst_256 {dimension_numbers = #tpu.dot_dimension_numbers<[2], [0], [0, 1], [1], [0, 0, 0, 1, 1, 1], [], []>} : vector<2x4x32xbf16>, vector<32x32xbf16>, vector<2x4x32xf32> -> vector<2x4x32xf32>
    %195 = arith.addf %189, %194 : vector<2x4x32xf32>
    %c0_257 = arith.constant 0 : index
    %c0_258 = arith.constant 0 : index
    %c0_259 = arith.constant 0 : index
    %196 = vector.load %arg16[%c0_257, %c0_258, %c0_259] : memref<1x1x32xf32, #tpu.memory_space<vmem>>, vector<1x1x32xf32>
    %197 = vector.broadcast %196 : vector<1x1x32xf32> to vector<2x4x32xf32>
    %198 = arith.addf %195, %197 : vector<2x4x32xf32>
    %199 = arith.addf %198, %174 : vector<2x4x32xf32>
    %cst_260 = arith.constant 0.000000e+00 : f32
    %200 = vector.broadcast %cst_260 : f32 to vector<2x4x32xf32>
    %201 = arith.maximumf %199, %200 : vector<2x4x32xf32>
    %cst_261 = arith.constant 0.000000e+00 : f32
    %202 = vector.broadcast %cst_261 : f32 to vector<2x1x32xf32>
    %c0_262 = arith.constant 0 : index
    %c0_263 = arith.constant 0 : index
    %c0_264 = arith.constant 0 : index
    %203 = vector.load %arg35[%c0_262, %c0_263, %c0_264] : memref<2x6x32xf32, #tpu.memory_space<vmem>>, vector<2x1x32xf32>
    tpu.vector_store %arg35[%c0_262, %c0_263, %c0_264], %202 {strides = array<i32>} : memref<2x6x32xf32, #tpu.memory_space<vmem>>, vector<2x1x32xf32>,
    %c0_265 = arith.constant 0 : index
    %c5_266 = arith.constant 5 : index
    %c0_267 = arith.constant 0 : index
    %204 = vector.load %arg35[%c0_265, %c5_266, %c0_267] : memref<2x6x32xf32, #tpu.memory_space<vmem>>, vector<2x1x32xf32>
    tpu.vector_store %arg35[%c0_265, %c5_266, %c0_267], %202 {strides = array<i32>} : memref<2x6x32xf32, #tpu.memory_space<vmem>>, vector<2x1x32xf32>,
    %c0_268 = arith.constant 0 : index
    %c1_269 = arith.constant 1 : index
    %c0_270 = arith.constant 0 : index
    %205 = vector.load %arg35[%c0_268, %c1_269, %c0_270] : memref<2x6x32xf32, #tpu.memory_space<vmem>>, vector<2x4x32xf32>
    tpu.vector_store %arg35[%c0_268, %c1_269, %c0_270], %201 {strides = array<i32>} : memref<2x6x32xf32, #tpu.memory_space<vmem>>, vector<2x4x32xf32>,
    %c0_271 = arith.constant 0 : index
    %c0_272 = arith.constant 0 : index
    %c0_273 = arith.constant 0 : index
    %206 = tpu.strided_load %arg35[%c0_271, %c0_272, %c0_273] {strides = array<i32: 1, 2, 1>} : memref<2x6x32xf32, #tpu.memory_space<vmem>>, vector<2x2x32xf32>
    %c0_274 = arith.constant 0 : index
    %c0_275 = arith.constant 0 : index
    %c0_276 = arith.constant 0 : index
    %207 = vector.load %arg19[%c0_274, %c0_275, %c0_276] : memref<3x32x64xbf16, #tpu.memory_space<vmem>>, vector<1x32x64xbf16>
    %208 = vector.shape_cast %207 : vector<1x32x64xbf16> to vector<32x64xbf16>
    %209 = arith.truncf %206 : vector<2x2x32xf32> to vector<2x2x32xbf16>
    %cst_277 = arith.constant dense<0.000000e+00> : vector<2x2x64xf32>
    %210 = tpu.matmul %209, %208, %cst_277 {dimension_numbers = #tpu.dot_dimension_numbers<[2], [0], [0, 1], [1], [0, 0, 0, 1, 1, 1], [], []>} : vector<2x2x32xbf16>, vector<32x64xbf16>, vector<2x2x64xf32> -> vector<2x2x64xf32>
    %c0_278 = arith.constant 0 : index
    %c1_279 = arith.constant 1 : index
    %c0_280 = arith.constant 0 : index
    %211 = tpu.strided_load %arg35[%c0_278, %c1_279, %c0_280] {strides = array<i32: 1, 2, 1>} : memref<2x6x32xf32, #tpu.memory_space<vmem>>, vector<2x2x32xf32>
    %c1_281 = arith.constant 1 : index
    %c0_282 = arith.constant 0 : index
    %c0_283 = arith.constant 0 : index
    %212 = vector.load %arg19[%c1_281, %c0_282, %c0_283] : memref<3x32x64xbf16, #tpu.memory_space<vmem>>, vector<1x32x64xbf16>
    %213 = vector.shape_cast %212 : vector<1x32x64xbf16> to vector<32x64xbf16>
    %214 = arith.truncf %211 : vector<2x2x32xf32> to vector<2x2x32xbf16>
    %cst_284 = arith.constant dense<0.000000e+00> : vector<2x2x64xf32>
    %215 = tpu.matmul %214, %213, %cst_284 {dimension_numbers = #tpu.dot_dimension_numbers<[2], [0], [0, 1], [1], [0, 0, 0, 1, 1, 1], [], []>} : vector<2x2x32xbf16>, vector<32x64xbf16>, vector<2x2x64xf32> -> vector<2x2x64xf32>
    %216 = arith.addf %210, %215 : vector<2x2x64xf32>
    %c0_285 = arith.constant 0 : index
    %c2_286 = arith.constant 2 : index
    %c0_287 = arith.constant 0 : index
    %217 = tpu.strided_load %arg35[%c0_285, %c2_286, %c0_287] {strides = array<i32: 1, 2, 1>} : memref<2x6x32xf32, #tpu.memory_space<vmem>>, vector<2x2x32xf32>
    %c2_288 = arith.constant 2 : index
    %c0_289 = arith.constant 0 : index
    %c0_290 = arith.constant 0 : index
    %218 = vector.load %arg19[%c2_288, %c0_289, %c0_290] : memref<3x32x64xbf16, #tpu.memory_space<vmem>>, vector<1x32x64xbf16>
    %219 = vector.shape_cast %218 : vector<1x32x64xbf16> to vector<32x64xbf16>
    %220 = arith.truncf %217 : vector<2x2x32xf32> to vector<2x2x32xbf16>
    %cst_291 = arith.constant dense<0.000000e+00> : vector<2x2x64xf32>
    %221 = tpu.matmul %220, %219, %cst_291 {dimension_numbers = #tpu.dot_dimension_numbers<[2], [0], [0, 1], [1], [0, 0, 0, 1, 1, 1], [], []>} : vector<2x2x32xbf16>, vector<32x64xbf16>, vector<2x2x64xf32> -> vector<2x2x64xf32>
    %222 = arith.addf %216, %221 : vector<2x2x64xf32>
    %c0_292 = arith.constant 0 : index
    %c0_293 = arith.constant 0 : index
    %c0_294 = arith.constant 0 : index
    %223 = vector.load %arg20[%c0_292, %c0_293, %c0_294] : memref<1x1x64xf32, #tpu.memory_space<vmem>>, vector<1x1x64xf32>
    %224 = vector.broadcast %223 : vector<1x1x64xf32> to vector<2x2x64xf32>
    %225 = arith.addf %222, %224 : vector<2x2x64xf32>
    %cst_295 = arith.constant 0.000000e+00 : f32
    %226 = vector.broadcast %cst_295 : f32 to vector<2x2x64xf32>
    %227 = arith.maximumf %225, %226 : vector<2x2x64xf32>
    %c0_296 = arith.constant 0 : index
    %c1_297 = arith.constant 1 : index
    %c0_298 = arith.constant 0 : index
    %228 = tpu.strided_load %arg35[%c0_296, %c1_297, %c0_298] {strides = array<i32: 1, 2, 1>} : memref<2x6x32xf32, #tpu.memory_space<vmem>>, vector<2x2x32xf32>
    %c0_299 = arith.constant 0 : index
    %c0_300 = arith.constant 0 : index
    %c0_301 = arith.constant 0 : index
    %229 = vector.load %arg23[%c0_299, %c0_300, %c0_301] : memref<1x32x64xbf16, #tpu.memory_space<vmem>>, vector<1x32x64xbf16>
    %230 = vector.shape_cast %229 : vector<1x32x64xbf16> to vector<32x64xbf16>
    %231 = arith.truncf %228 : vector<2x2x32xf32> to vector<2x2x32xbf16>
    %cst_302 = arith.constant dense<0.000000e+00> : vector<2x2x64xf32>
    %232 = tpu.matmul %231, %230, %cst_302 {dimension_numbers = #tpu.dot_dimension_numbers<[2], [0], [0, 1], [1], [0, 0, 0, 1, 1, 1], [], []>} : vector<2x2x32xbf16>, vector<32x64xbf16>, vector<2x2x64xf32> -> vector<2x2x64xf32>
    %c0_303 = arith.constant 0 : index
    %c0_304 = arith.constant 0 : index
    %c0_305 = arith.constant 0 : index
    %233 = vector.load %arg24[%c0_303, %c0_304, %c0_305] : memref<1x1x64xf32, #tpu.memory_space<vmem>>, vector<1x1x64xf32>
    %234 = vector.broadcast %233 : vector<1x1x64xf32> to vector<2x2x64xf32>
    %235 = arith.addf %232, %234 : vector<2x2x64xf32>
    %cst_306 = arith.constant 0.000000e+00 : f32
    %236 = vector.broadcast %cst_306 : f32 to vector<2x1x64xf32>
    %c0_307 = arith.constant 0 : index
    %c0_308 = arith.constant 0 : index
    %c0_309 = arith.constant 0 : index
    %237 = vector.load %arg36[%c0_307, %c0_308, %c0_309] : memref<2x4x64xf32, #tpu.memory_space<vmem>>, vector<2x1x64xf32>
    tpu.vector_store %arg36[%c0_307, %c0_308, %c0_309], %236 {strides = array<i32>} : memref<2x4x64xf32, #tpu.memory_space<vmem>>, vector<2x1x64xf32>,
    %c0_310 = arith.constant 0 : index
    %c3 = arith.constant 3 : index
    %c0_311 = arith.constant 0 : index
    %238 = vector.load %arg36[%c0_310, %c3, %c0_311] : memref<2x4x64xf32, #tpu.memory_space<vmem>>, vector<2x1x64xf32>
    tpu.vector_store %arg36[%c0_310, %c3, %c0_311], %236 {strides = array<i32>} : memref<2x4x64xf32, #tpu.memory_space<vmem>>, vector<2x1x64xf32>,
    %c0_312 = arith.constant 0 : index
    %c1_313 = arith.constant 1 : index
    %c0_314 = arith.constant 0 : index
    %239 = vector.load %arg36[%c0_312, %c1_313, %c0_314] : memref<2x4x64xf32, #tpu.memory_space<vmem>>, vector<2x2x64xf32>
    tpu.vector_store %arg36[%c0_312, %c1_313, %c0_314], %227 {strides = array<i32>} : memref<2x4x64xf32, #tpu.memory_space<vmem>>, vector<2x2x64xf32>,
    %c0_315 = arith.constant 0 : index
    %c0_316 = arith.constant 0 : index
    %c0_317 = arith.constant 0 : index
    %240 = vector.load %arg36[%c0_315, %c0_316, %c0_317] : memref<2x4x64xf32, #tpu.memory_space<vmem>>, vector<2x2x64xf32>
    %c0_318 = arith.constant 0 : index
    %c0_319 = arith.constant 0 : index
    %c0_320 = arith.constant 0 : index
    %241 = vector.load %arg21[%c0_318, %c0_319, %c0_320] : memref<3x64x64xbf16, #tpu.memory_space<vmem>>, vector<1x64x64xbf16>
    %242 = vector.shape_cast %241 : vector<1x64x64xbf16> to vector<64x64xbf16>
    %243 = arith.truncf %240 : vector<2x2x64xf32> to vector<2x2x64xbf16>
    %cst_321 = arith.constant dense<0.000000e+00> : vector<2x2x64xf32>
    %244 = tpu.matmul %243, %242, %cst_321 {dimension_numbers = #tpu.dot_dimension_numbers<[2], [0], [0, 1], [1], [0, 0, 0, 1, 1, 1], [], []>} : vector<2x2x64xbf16>, vector<64x64xbf16>, vector<2x2x64xf32> -> vector<2x2x64xf32>
    %c0_322 = arith.constant 0 : index
    %c1_323 = arith.constant 1 : index
    %c0_324 = arith.constant 0 : index
    %245 = vector.load %arg36[%c0_322, %c1_323, %c0_324] : memref<2x4x64xf32, #tpu.memory_space<vmem>>, vector<2x2x64xf32>
    %c1_325 = arith.constant 1 : index
    %c0_326 = arith.constant 0 : index
    %c0_327 = arith.constant 0 : index
    %246 = vector.load %arg21[%c1_325, %c0_326, %c0_327] : memref<3x64x64xbf16, #tpu.memory_space<vmem>>, vector<1x64x64xbf16>
    %247 = vector.shape_cast %246 : vector<1x64x64xbf16> to vector<64x64xbf16>
    %248 = arith.truncf %245 : vector<2x2x64xf32> to vector<2x2x64xbf16>
    %cst_328 = arith.constant dense<0.000000e+00> : vector<2x2x64xf32>
    %249 = tpu.matmul %248, %247, %cst_328 {dimension_numbers = #tpu.dot_dimension_numbers<[2], [0], [0, 1], [1], [0, 0, 0, 1, 1, 1], [], []>} : vector<2x2x64xbf16>, vector<64x64xbf16>, vector<2x2x64xf32> -> vector<2x2x64xf32>
    %250 = arith.addf %244, %249 : vector<2x2x64xf32>
    %c0_329 = arith.constant 0 : index
    %c2_330 = arith.constant 2 : index
    %c0_331 = arith.constant 0 : index
    %251 = vector.load %arg36[%c0_329, %c2_330, %c0_331] : memref<2x4x64xf32, #tpu.memory_space<vmem>>, vector<2x2x64xf32>
    %c2_332 = arith.constant 2 : index
    %c0_333 = arith.constant 0 : index
    %c0_334 = arith.constant 0 : index
    %252 = vector.load %arg21[%c2_332, %c0_333, %c0_334] : memref<3x64x64xbf16, #tpu.memory_space<vmem>>, vector<1x64x64xbf16>
    %253 = vector.shape_cast %252 : vector<1x64x64xbf16> to vector<64x64xbf16>
    %254 = arith.truncf %251 : vector<2x2x64xf32> to vector<2x2x64xbf16>
    %cst_335 = arith.constant dense<0.000000e+00> : vector<2x2x64xf32>
    %255 = tpu.matmul %254, %253, %cst_335 {dimension_numbers = #tpu.dot_dimension_numbers<[2], [0], [0, 1], [1], [0, 0, 0, 1, 1, 1], [], []>} : vector<2x2x64xbf16>, vector<64x64xbf16>, vector<2x2x64xf32> -> vector<2x2x64xf32>
    %256 = arith.addf %250, %255 : vector<2x2x64xf32>
    %c0_336 = arith.constant 0 : index
    %c0_337 = arith.constant 0 : index
    %c0_338 = arith.constant 0 : index
    %257 = vector.load %arg22[%c0_336, %c0_337, %c0_338] : memref<1x1x64xf32, #tpu.memory_space<vmem>>, vector<1x1x64xf32>
    %258 = vector.broadcast %257 : vector<1x1x64xf32> to vector<2x2x64xf32>
    %259 = arith.addf %256, %258 : vector<2x2x64xf32>
    %260 = arith.addf %259, %235 : vector<2x2x64xf32>
    %cst_339 = arith.constant 0.000000e+00 : f32
    %261 = vector.broadcast %cst_339 : f32 to vector<2x2x64xf32>
    %262 = arith.maximumf %260, %261 : vector<2x2x64xf32>
    %cst_340 = arith.constant dense<0.000000e+00> : vector<2x64xf32>
    %263 = vector.multi_reduction <add>, %262, %cst_340 [1] : vector<2x2x64xf32> to vector<2x64xf32>
    %cst_341 = arith.constant 2.000000e+00 : f32
    %264 = vector.broadcast %cst_341 : f32 to vector<2x64xf32>
    %265 = arith.divf %263, %264 : vector<2x64xf32>
    %c0_342 = arith.constant 0 : index
    %c0_343 = arith.constant 0 : index
    %266 = vector.load %arg25[%c0_342, %c0_343] : memref<64x16xf32, #tpu.memory_space<vmem>>, vector<64x16xf32>
    %cst_344 = arith.constant dense<0.000000e+00> : vector<2x16xf32>
    %267 = tpu.matmul %265, %266, %cst_344 {dimension_numbers = #tpu.dot_dimension_numbers<[1], [0], [0], [1], [0, 0, 1, 1], [], []>} : vector<2x64xf32>, vector<64x16xf32>, vector<2x16xf32> -> vector<2x16xf32>
    %c0_345 = arith.constant 0 : index
    %c0_346 = arith.constant 0 : index
    %268 = vector.load %arg26[%c0_345, %c0_346] : memref<1x16xf32, #tpu.memory_space<vmem>>, vector<1x16xf32>
    %269 = vector.broadcast %268 : vector<1x16xf32> to vector<2x16xf32>
    %270 = arith.addf %267, %269 : vector<2x16xf32>
    %c0_347 = arith.constant 0 : index
    %c0_348 = arith.constant 0 : index
    %271 = vector.load %arg27[%c0_347, %c0_348] : memref<2x16xf32, #tpu.memory_space<vmem>>, vector<2x16xf32>
    tpu.vector_store %arg27[%c0_347, %c0_348], %270 {strides = array<i32>} : memref<2x16xf32, #tpu.memory_space<vmem>>, vector<2x16xf32>,
    return
  }
}

</mosaic_0001>

<bundles_post_ra>
// kernel: tpu_custom_call.1
= control target key start
LH: loop header
LB: loop body
LE: loop exit
PB: predicated region body
PF: predicated region fallthrough
CT: control target
= control target key end

     0   :  { %s4747_s0 = inlined_call_operand.vmem [shape: f32[2,16,7], index: 0, kind: input, shape index: {}]   ;;  %s4748_s1 = inlined_call_operand.hbm [shape: bf16[3,7,8], index: 1, kind: input, shape index: {}]   ;;  %s4749_s2 = inlined_call_operand.vmem [shape: f32[1,1,8], index: 2, kind: input, shape index: {}]   ;;  %s4750_s3 = inlined_call_operand.hbm [shape: bf16[3,8,8], index: 3, kind: input, shape index: {}]   ;;  %s4751_s4 = inlined_call_operand.hbm [shape: f32[1,1,8], index: 4, kind: input, shape index: {}]   ;;  %s4752_s5 = inlined_call_operand.hbm [shape: bf16[3,8,8], index: 5, kind: input, shape index: {}]   ;;  %s4753_s6 = inlined_call_operand.hbm [shape: f32[1,1,8], index: 6, kind: input, shape index: {}]   ;;  %s4754_s7 = inlined_call_operand.hbm [shape: bf16[3,8,16], index: 7, kind: input, shape index: {}]   ;;  %s4755_s8 = inlined_call_operand.hbm [shape: f32[1,1,16], index: 8, kind: input, shape index: {}]   ;;  %s4756_s9 = inlined_call_operand.hbm [shape: bf16[3,16,16], index: 9, kind: input, shape index: {}]   ;;  %s4757_s10 = inlined_call_operand.hbm [shape: f32[1,1,16], index: 10, kind: input, shape index: {}]   ;;  %s4758_s11 = inlined_call_operand.hbm [shape: bf16[1,8,16], index: 11, kind: input, shape index: {}]   ;;  %s4759_s12 = inlined_call_operand.hbm [shape: f32[1,1,16], index: 12, kind: input, shape index: {}]   ;;  %s4760_s13 = inlined_call_operand.hbm [shape: bf16[3,16,32], index: 13, kind: input, shape index: {}]   ;;  %s4761_s14 = inlined_call_operand.hbm [shape: f32[1,1,32], index: 14, kind: input, shape index: {}]   ;;  %s4762_s15 = inlined_call_operand.vmem [shape: bf16[3,32,32], index: 15, kind: input, shape index: {}]   ;;  %s4763_s16 = inlined_call_operand.hbm [shape: f32[1,1,32], index: 16, kind: input, shape index: {}]   ;;  %s4764_s17 = inlined_call_operand.hbm [shape: bf16[1,16,32], index: 17, kind: input, shape index: {}]   ;;  %s4765_s18 = inlined_call_operand.hbm [shape: f32[1,1,32], index: 18, kind: input, shape index: {}]   ;;  %s4766_s19 = inlined_call_operand.vmem [shape: bf16[3,32,64], index: 19, kind: input, shape index: {}]   ;;  %s4767_s20 = inlined_call_operand.hbm [shape: f32[1,1,64], index: 20, kind: input, shape index: {}]   ;;  %s4768_s21 = inlined_call_operand.vmem [shape: bf16[3,64,64], index: 21, kind: input, shape index: {}]   ;;  %s4769_s22 = inlined_call_operand.hbm [shape: f32[1,1,64], index: 22, kind: input, shape index: {}]   ;;  %s4770_s23 = inlined_call_operand.hbm [shape: bf16[1,32,64], index: 23, kind: input, shape index: {}]   ;;  %s4771_s24 = inlined_call_operand.vmem [shape: f32[1,1,64], index: 24, kind: input, shape index: {}]   ;;  %s4772_s25 = inlined_call_operand.vmem [shape: f32[64,16], index: 25, kind: input, shape index: {}]   ;;  %s4773_s26 = inlined_call_operand.vmem [shape: f32[1,16], index: 26, kind: input, shape index: {}]   ;;  %s4774_s27 = inlined_call_operand.hbm [shape: f32[2,16], index: 27, kind: output, shape index: {}]  }
   0x1   :  { %4787 = sst [smem:[#allocation53_spill]] %s4747_s0 }
   0x2   :  { %4788 = sst [smem:[#allocation54_spill]] %s4748_s1 }
   0x3   :  { %4789 = sst [smem:[#allocation55_spill]] %s4749_s2 }
   0x4   :  { %4790 = sst [smem:[#allocation56_spill]] %s4750_s3 }
   0x5   :  { %4791 = sst [smem:[#allocation57_spill]] %s4751_s4 }
   0x6   :  { %4792 = sst [smem:[#allocation58_spill]] %s4752_s5 }
   0x7   :  { %4793 = sst [smem:[#allocation59_spill]] %s4753_s6 }
   0x8   :  { %4794 = sst [smem:[#allocation60_spill]] %s4754_s7 }
   0x9   :  { %4795 = sst [smem:[#allocation61_spill]] %s4755_s8 }
   0xa   :  { %4796 = sst [smem:[#allocation62_spill]] %s4756_s9 }
   0xb   :  { %4797 = sst [smem:[#allocation63_spill]] %s4757_s10 }
   0xc   :  { %4798 = sst [smem:[#allocation64_spill]] %s4758_s11 }
   0xd   :  { %4799 = sst [smem:[#allocation65_spill]] %s4771_s24 }
   0xe   :  { %4800 = sst [smem:[#allocation66_spill]] %s4773_s26 }
   0xf   :  { %4801 = sst [smem:[#allocation67_spill]] %s4774_s27 }
  0x10   :  { %32 = vsyncpa [#allocation12], 0 }
  0x11   :  { %33 = vsyncpa [#allocation15], 0 }
  0x12   :  { %34 = vsyncpa [#allocation18], 0 }
  0x13   :  { %35 = vsyncpa [#allocation21], 0 }
  0x14   :  { %36 = vsyncpa [#allocation24], 0 }
  0x15   :  { %37 = vsyncpa [#allocation27], 0 }
  0x16   :  { %38 = vsyncpa [#allocation30], 0 }
  0x17   :  { %39 = vsyncpa [#allocation33], 0 }
  0x18   :  { %40 = vsyncpa [#allocation36], 0 }
  0x19   :  { %41 = vsyncpa [#allocation39], 0 }
  0x1a   :  { %42 = vsyncpa [#allocation13], 0  ;;  %s3911_s7 = smov [#allocation14]   ;;  %s3912_s8 = smov [#allocation17]  }
  0x1b   :  { %s64_s4 = sshll.u32 %s3911_s7, 4  ;;  %s86_s30 = sshll.u32 %s3912_s8, 4  ;;  %s65_s4 = int_to_ptr.vmem [resolvable:$true] %s64_s4  ;;  %s4079_s30 = int_to_ptr.vmem [resolvable:$true] %s86_s30 }
  0x1c   :  { %s4802_s28 = sld [smem:[#allocation56_spill]] }
  0x22   :  { %s3449_s0 = scalar_lea.hbm %s4802_s28, 192 }
  0x23   :  { %p3450_p0 = scmp.ne.s32.totalorder %s4802_s28, %s3449_s0  ;;  %p3453_p1 = scmp.lt.u32.totalorder %s3449_s0, %s4802_s28 }
  0x25   :  { %p3455_p2 = pnand %p3453_p1, %p3450_p0 }
  0x27   :  { %3458 = shalt.err (!%p3455_p2)
}
  0x28   :  { %s3459_s11 = scalar_lea.vmem %s65_s4, 192  ;;  %p3464_p4 = scmp.lt.s32.totalorder %s65_s4, %s65_s4 }
  0x29   :  { %p3460_p3 = scmp.ne.s32.totalorder %s65_s4, %s3459_s11  ;;  %p3465_p5 = scmp.lt.s32.totalorder %s3459_s11, %s3459_s11 }
  0x2b   :  { %p3466_p6 = por %p3465_p5, %p3464_p4 }
  0x2d   :  { %p3467_p7 = pnand %p3466_p6, %p3460_p3 }
  0x2f   :  { %3470 = shalt.err (!%p3467_p7)
}
  0x30   :  { %s3913_s2 = smov 64   ;;  %s3914_s3 = smov 4  }
  0x31   :  { %70 = dma.hbm_to_vmem [thread:$0]  %s4802_s28, 192, %s65_s4, [#allocation15], %s3913_s2, %s3913_s2, %s3914_s3  }
  0x32   :  { %s4803_s0 = sld [smem:[#allocation58_spill]] }
  0x38   :  { %s3471_s10 = scalar_lea.hbm %s4803_s0, 192 }
  0x39   :  { %p3472_p8 = scmp.ne.s32.totalorder %s4803_s0, %s3471_s10  ;;  %p3475_p9 = scmp.lt.u32.totalorder %s3471_s10, %s4803_s0 }
  0x3b   :  { %p3477_p10 = pnand %p3475_p9, %p3472_p8 }
  0x3d   :  { %3480 = shalt.err (!%p3477_p10)
}
  0x3e   :  { %s3481_s27 = scalar_lea.vmem %s4079_s30, 192  ;;  %p3486_p12 = scmp.lt.s32.totalorder %s4079_s30, %s4079_s30 }
  0x3f   :  { %p3482_p11 = scmp.ne.s32.totalorder %s4079_s30, %s3481_s27  ;;  %p3487_p13 = scmp.lt.s32.totalorder %s3481_s27, %s3481_s27 }
  0x41   :  { %p3488_p0 = por %p3487_p13, %p3486_p12 }
  0x43   :  { %p3489_p1 = pnand %p3488_p0, %p3482_p11 }
  0x45   :  { %3492 = shalt.err (!%p3489_p1)
}
  0x46   :  { %92 = dma.hbm_to_vmem [thread:$0]  %s4803_s0, 192, %s4079_s30, [#allocation18], %s3913_s2, %s3913_s2, %s3914_s3  }
  0x47   :  { %s3915_s7 = smov [#allocation20]   ;;  %s3916_s9 = smov [#allocation23]  }
  0x48   :  { %s108_s8 = sshll.u32 %s3915_s7, 4  ;;  %s130_s5 = sshll.u32 %s3916_s9, 4  ;;  %s109_s8 = int_to_ptr.vmem [resolvable:$true] %s108_s8  ;;  %s4116_s5 = int_to_ptr.vmem [resolvable:$true] %s130_s5 }
  0x49   :  { %s4804_s29 = sld [smem:[#allocation60_spill]] }
  0x4f   :  { %s3493_s1 = scalar_lea.hbm %s4804_s29, 192 }
  0x50   :  { %p3494_p2 = scmp.ne.s32.totalorder %s4804_s29, %s3493_s1  ;;  %p3497_p3 = scmp.lt.u32.totalorder %s3493_s1, %s4804_s29 }
  0x52   :  { %p3499_p4 = pnand %p3497_p3, %p3494_p2 }
  0x54   :  { %3502 = shalt.err (!%p3499_p4)
}
  0x55   :  { %s3503_s30 = scalar_lea.vmem %s109_s8, 192  ;;  %p3508_p6 = scmp.lt.s32.totalorder %s109_s8, %s109_s8 }
  0x56   :  { %p3504_p5 = scmp.ne.s32.totalorder %s109_s8, %s3503_s30  ;;  %p3509_p7 = scmp.lt.s32.totalorder %s3503_s30, %s3503_s30 }
  0x58   :  { %p3510_p8 = por %p3509_p7, %p3508_p6 }
  0x5a   :  { %p3511_p9 = pnand %p3510_p8, %p3504_p5 }
  0x5c   :  { %3514 = shalt.err (!%p3511_p9)
}
  0x5d   :  { %114 = dma.hbm_to_vmem [thread:$0]  %s4804_s29, 192, %s109_s8, [#allocation21], %s3913_s2, %s3913_s2, %s3914_s3  }
  0x5e   :  { %s4805_s24 = sld [smem:[#allocation62_spill]] }
  0x64   :  { %s3515_s26 = scalar_lea.hbm %s4805_s24, 384 }
  0x65   :  { %p3516_p10 = scmp.ne.s32.totalorder %s4805_s24, %s3515_s26  ;;  %p3519_p11 = scmp.lt.u32.totalorder %s3515_s26, %s4805_s24 }
  0x67   :  { %p3521_p12 = pnand %p3519_p11, %p3516_p10 }
  0x69   :  { %3524 = shalt.err (!%p3521_p12)
}
  0x6a   :  { %s3525_s6 = scalar_lea.vmem %s4116_s5, 384  ;;  %p3530_p0 = scmp.lt.s32.totalorder %s4116_s5, %s4116_s5 }
  0x6b   :  { %p3526_p13 = scmp.ne.s32.totalorder %s4116_s5, %s3525_s6  ;;  %p3531_p1 = scmp.lt.s32.totalorder %s3525_s6, %s3525_s6 }
  0x6d   :  { %p3532_p2 = por %p3531_p1, %p3530_p0 }
  0x6f   :  { %p3533_p3 = pnand %p3532_p2, %p3526_p13 }
  0x71   :  { %3536 = shalt.err (!%p3533_p3)
}
  0x72   :  { %136 = dma.hbm_to_vmem [thread:$0]  %s4805_s24, 384, %s4116_s5, [#allocation24], %s3913_s2, %s3913_s2, %s3914_s3  }
  0x73   :  { %s3917_s11 = smov [#allocation26]   ;;  %s3918_s0 = smov [#allocation29]  }
  0x74   :  { %s153_s30 = sshll.u32 %s3917_s11, 4  ;;  %s172_s4 = sshll.u32 %s3918_s0, 4  ;;  %s154_s30 = int_to_ptr.vmem [resolvable:$true] %s153_s30  ;;  %s4153_s4 = int_to_ptr.vmem [resolvable:$true] %s172_s4 }
  0x75   :  { %s4806_s26 = sld [smem:[#allocation64_spill]] }
  0x7b   :  { %s3537_s9 = scalar_lea.hbm %s4806_s26, 64 }
  0x7c   :  { %p3538_p4 = scmp.ne.s32.totalorder %s4806_s26, %s3537_s9  ;;  %p3541_p5 = scmp.lt.u32.totalorder %s3537_s9, %s4806_s26 }
  0x7e   :  { %p3543_p6 = pnand %p3541_p5, %p3538_p4 }
  0x80   :  { %3546 = shalt.err (!%p3543_p6)
}
  0x81   :  { %s3547_s5 = scalar_lea.vmem %s154_s30, 64  ;;  %p3552_p8 = scmp.lt.s32.totalorder %s154_s30, %s154_s30 }
  0x82   :  { %p3548_p7 = scmp.ne.s32.totalorder %s154_s30, %s3547_s5  ;;  %p3553_p9 = scmp.lt.s32.totalorder %s3547_s5, %s3547_s5 }
  0x84   :  { %p3554_p10 = por %p3553_p9, %p3552_p8 }
  0x86   :  { %p3555_p11 = pnand %p3554_p10, %p3548_p7 }
  0x88   :  { %3558 = shalt.err (!%p3555_p11)
}
  0x89   :  { %156 = dma.hbm_to_vmem [thread:$0]  %s4806_s26, 64, %s154_s30, [#allocation27]  }
  0x8a   :  { %s3559_s0 = scalar_lea.hbm %s4760_s13, 384 }
  0x8b   :  { %p3560_p12 = scmp.ne.s32.totalorder %s4760_s13, %s3559_s0  ;;  %p3563_p13 = scmp.lt.u32.totalorder %s3559_s0, %s4760_s13 }
  0x8d   :  { %p3565_p0 = pnand %p3563_p13, %p3560_p12 }
  0x8f   :  { %3568 = shalt.err (!%p3565_p0)
}
  0x90   :  { %s3569_s27 = scalar_lea.vmem %s4153_s4, 384  ;;  %p3574_p2 = scmp.lt.s32.totalorder %s4153_s4, %s4153_s4 }
  0x91   :  { %p3570_p1 = scmp.ne.s32.totalorder %s4153_s4, %s3569_s27  ;;  %p3575_p3 = scmp.lt.s32.totalorder %s3569_s27, %s3569_s27 }
  0x93   :  { %p3576_p4 = por %p3575_p3, %p3574_p2 }
  0x95   :  { %p3577_p5 = pnand %p3576_p4, %p3570_p1 }
  0x97   :  { %3580 = shalt.err (!%p3577_p5)
}
  0x98   :  { %178 = dma.hbm_to_vmem [thread:$0]  %s4760_s13, 384, %s4153_s4, [#allocation30], %s3913_s2, %s3913_s2, %s3914_s3  }
  0x99   :  { %s3919_s1 = smov [#allocation32]   ;;  %s3920_s5 = smov [#allocation35]  }
  0x9a   :  { %s197_s6 = sshll.u32 %s3919_s1, 4  ;;  %s219_s24 = sshll.u32 %s3920_s5, 4  ;;  %s198_s6 = int_to_ptr.vmem [resolvable:$true] %s197_s6  ;;  %s220_s24 = int_to_ptr.vmem [resolvable:$true] %s219_s24 }
  0x9b   :  { %s3581_s11 = scalar_lea.hbm %s4763_s16, 16 }
  0x9c   :  { %p3582_p6 = scmp.ne.s32.totalorder %s4763_s16, %s3581_s11  ;;  %p3585_p7 = scmp.lt.u32.totalorder %s3581_s11, %s4763_s16 }
  0x9e   :  { %p3587_p8 = pnand %p3585_p7, %p3582_p6 }
  0xa0   :  { %3590 = shalt.err (!%p3587_p8)
}
  0xa1   :  { %s3591_s13 = scalar_lea.vmem %s198_s6, 16  ;;  %s3595_s4 = scalar_lea.vmem %s198_s6, 32 }
  0xa2   :  { %p3592_p9 = scmp.ne.s32.totalorder %s198_s6, %s3591_s13  ;;  %p3596_p10 = scmp.lt.s32.totalorder %s198_s6, %s198_s6 }
  0xa3   :  { %p3597_p11 = scmp.lt.s32.totalorder %s3595_s4, %s3591_s13 }
  0xa5   :  { %p3598_p12 = por %p3597_p11, %p3596_p10 }
  0xa7   :  { %p3599_p13 = pnand %p3598_p12, %p3592_p9 }
  0xa9   :  { %3602 = shalt.err (!%p3599_p13)
}
  0xaa   :  { %200 = dma.hbm_to_vmem [thread:$0]  %s4763_s16, 16, %s198_s6, [#allocation33]  }
  0xab   :  { %s3603_s1 = scalar_lea.hbm %s4765_s18, 16 }
  0xac   :  { %p3604_p0 = scmp.ne.s32.totalorder %s4765_s18, %s3603_s1  ;;  %p3607_p1 = scmp.lt.u32.totalorder %s3603_s1, %s4765_s18 }
  0xae   :  { %p3609_p2 = pnand %p3607_p1, %p3604_p0 }
  0xb0   :  { %3612 = shalt.err (!%p3609_p2)
}
  0xb1   :  { %s3613_s0 = scalar_lea.vmem %s220_s24, 16  ;;  %s3617_s28 = scalar_lea.vmem %s220_s24, 32 }
  0xb2   :  { %p3614_p3 = scmp.ne.s32.totalorder %s220_s24, %s3613_s0  ;;  %p3618_p4 = scmp.lt.s32.totalorder %s220_s24, %s220_s24 }
  0xb3   :  { %p3619_p5 = scmp.lt.s32.totalorder %s3617_s28, %s3613_s0 }
  0xb5   :  { %p3620_p6 = por %p3619_p5, %p3618_p4 }
  0xb7   :  { %p3621_p7 = pnand %p3620_p6, %p3614_p3 }
  0xb9   :  { %3624 = shalt.err (!%p3621_p7)
}
  0xba   :  { %222 = dma.hbm_to_vmem [thread:$0]  %s4765_s18, 16, %s220_s24, [#allocation36]  }
  0xbb   :  { %s3921_s7 = smov [#allocation38]   ;;  %s3922_s13 = smov [#allocation11]  }
  0xbc   :  { %s243_s9 = sshll.u32 %s3921_s7, 4  ;;  %s50_s4 = sshll.u32 %s3922_s13, 4  ;;  %s244_s9 = int_to_ptr.vmem [resolvable:$true] %s243_s9  ;;  %s4211_s4 = int_to_ptr.vmem [resolvable:$true] %s50_s4 }
  0xbd   :  { %s3625_s30 = scalar_lea.hbm %s4769_s22, 16 }
  0xbe   :  { %p3626_p8 = scmp.ne.s32.totalorder %s4769_s22, %s3625_s30  ;;  %p3629_p9 = scmp.lt.u32.totalorder %s3625_s30, %s4769_s22 }
  0xc0   :  { %p3631_p10 = pnand %p3629_p9, %p3626_p8 }
  0xc2   :  { %3634 = shalt.err (!%p3631_p10)
}
  0xc3   :  { %s3635_s18 = scalar_lea.vmem %s244_s9, 16  ;;  %s3639_s24 = scalar_lea.vmem %s244_s9, 32 }
  0xc4   :  { %p3636_p11 = scmp.ne.s32.totalorder %s244_s9, %s3635_s18  ;;  %p3640_p12 = scmp.lt.s32.totalorder %s244_s9, %s244_s9 }
  0xc5   :  { %p3641_p13 = scmp.lt.s32.totalorder %s3639_s24, %s3635_s18 }
  0xc7   :  { %p3642_p0 = por %p3641_p13, %p3640_p12 }
  0xc9   :  { %p3643_p1 = pnand %p3642_p0, %p3636_p11 }
  0xcb   :  { %3646 = shalt.err (!%p3643_p1)
}
  0xcc   :  { %246 = dma.hbm_to_vmem [thread:$0]  %s4769_s22, 16, %s244_s9, [#allocation39]  }
  0xcd   :  { %s4807_s16 = sld [smem:[#allocation54_spill]] }
  0xd3   :  { %s3647_s6 = scalar_lea.hbm %s4807_s16, 192 }
  0xd4   :  { %p3648_p2 = scmp.ne.s32.totalorder %s4807_s16, %s3647_s6  ;;  %p3651_p3 = scmp.lt.u32.totalorder %s3647_s6, %s4807_s16 }
  0xd6   :  { %p3653_p4 = pnand %p3651_p3, %p3648_p2 }
  0xd8   :  { %3656 = shalt.err (!%p3653_p4)
}
  0xd9   :  { %s3657_s30 = scalar_lea.vmem %s4211_s4, 192  ;;  %p3662_p6 = scmp.lt.s32.totalorder %s4211_s4, %s4211_s4 }
  0xda   :  { %p3658_p5 = scmp.ne.s32.totalorder %s4211_s4, %s3657_s30  ;;  %p3663_p7 = scmp.lt.s32.totalorder %s3657_s30, %s3657_s30 }
  0xdc   :  { %p3664_p8 = por %p3663_p7, %p3662_p6 }
  0xde   :  { %p3665_p9 = pnand %p3664_p8, %p3658_p5 }
  0xe0   :  { %3668 = shalt.err (!%p3665_p9)
}
  0xe1   :  { %56 = dma.hbm_to_vmem [thread:$0]  %s4807_s16, 192, %s4211_s4, [#allocation12], %s3913_s2, %s3913_s2, %s3914_s3  }
  0xe2   :  { %s3923_s26 = smov [#allocation16]   ;;  %s3924_s5 = smov [#allocation19]  }
  0xe3   :  { %s77_s1 = sshll.u32 %s3923_s26, 4  ;;  %s99_s8 = sshll.u32 %s3924_s5, 4  ;;  %s78_s1 = int_to_ptr.vmem [resolvable:$true] %s77_s1  ;;  %s100_s8 = int_to_ptr.vmem [resolvable:$true] %s99_s8 }
  0xe4   :  { %s4808_s29 = sld [smem:[#allocation57_spill]] }
  0xea   :  { %s3669_s11 = scalar_lea.hbm %s4808_s29, 16 }
  0xeb   :  { %p3670_p10 = scmp.ne.s32.totalorder %s4808_s29, %s3669_s11  ;;  %p3673_p11 = scmp.lt.u32.totalorder %s3669_s11, %s4808_s29 }
  0xed   :  { %p3675_p12 = pnand %p3673_p11, %p3670_p10 }
  0xef   :  { %3678 = shalt.err (!%p3675_p12)
}
  0xf0   :  { %s3679_s4 = scalar_lea.vmem %s78_s1, 16  ;;  %s3683_s16 = scalar_lea.vmem %s78_s1, 32 }
  0xf1   :  { %p3680_p13 = scmp.ne.s32.totalorder %s78_s1, %s3679_s4  ;;  %p3684_p0 = scmp.lt.s32.totalorder %s78_s1, %s78_s1 }
  0xf2   :  { %p3685_p1 = scmp.lt.s32.totalorder %s3683_s16, %s3679_s4 }
  0xf4   :  { %p3686_p2 = por %p3685_p1, %p3684_p0 }
  0xf6   :  { %p3687_p3 = pnand %p3686_p2, %p3680_p13 }
  0xf8   :  { %3690 = shalt.err (!%p3687_p3)
}
  0xf9   :  { %80 = dma.hbm_to_vmem [thread:$0]  %s4808_s29, 16, %s78_s1, [#allocation15]  }
  0xfa   :  { %s4809_s22 = sld [smem:[#allocation59_spill]] }
 0x100   :  { %s3691_s9 = scalar_lea.hbm %s4809_s22, 16 }
 0x101   :  { %p3692_p4 = scmp.ne.s32.totalorder %s4809_s22, %s3691_s9  ;;  %p3695_p5 = scmp.lt.u32.totalorder %s3691_s9, %s4809_s22 }
 0x103   :  { %p3697_p6 = pnand %p3695_p5, %p3692_p4 }
 0x105   :  { %3700 = shalt.err (!%p3697_p6)
}
 0x106   :  { %s3701_s11 = scalar_lea.vmem %s100_s8, 16  ;;  %s3705_s0 = scalar_lea.vmem %s100_s8, 32 }
 0x107   :  { %p3702_p7 = scmp.ne.s32.totalorder %s100_s8, %s3701_s11  ;;  %p3706_p8 = scmp.lt.s32.totalorder %s100_s8, %s100_s8 }
 0x108   :  { %p3707_p9 = scmp.lt.s32.totalorder %s3705_s0, %s3701_s11 }
 0x10a   :  { %p3708_p10 = por %p3707_p9, %p3706_p8 }
 0x10c   :  { %p3709_p11 = pnand %p3708_p10, %p3702_p7 }
 0x10e   :  { %3712 = shalt.err (!%p3709_p11)
}
 0x10f   :  { %102 = dma.hbm_to_vmem [thread:$0]  %s4809_s22, 16, %s100_s8, [#allocation18]  }
 0x110   :  { %s3925_s28 = smov [#allocation22]   ;;  %s3926_s7 = smov [#allocation25]  }
 0x111   :  { %s121_s6 = sshll.u32 %s3925_s28, 4  ;;  %s143_s4 = sshll.u32 %s3926_s7, 4  ;;  %s122_s6 = int_to_ptr.vmem [resolvable:$true] %s121_s6  ;;  %s144_s4 = int_to_ptr.vmem [resolvable:$true] %s143_s4 }
 0x112   :  { %s4810_s10 = sld [smem:[#allocation61_spill]] }
 0x118   :  { %s3713_s27 = scalar_lea.hbm %s4810_s10, 16 }
 0x119   :  { %p3714_p12 = scmp.ne.s32.totalorder %s4810_s10, %s3713_s27  ;;  %p3717_p13 = scmp.lt.u32.totalorder %s3713_s27, %s4810_s10 }
 0x11b   :  { %p3719_p0 = pnand %p3717_p13, %p3714_p12 }
 0x11d   :  { %3722 = shalt.err (!%p3719_p0)
}
 0x11e   :  { %s3723_s8 = scalar_lea.vmem %s122_s6, 16  ;;  %s3727_s22 = scalar_lea.vmem %s122_s6, 32 }
 0x11f   :  { %p3724_p1 = scmp.ne.s32.totalorder %s122_s6, %s3723_s8  ;;  %p3728_p2 = scmp.lt.s32.totalorder %s122_s6, %s122_s6 }
 0x120   :  { %p3729_p3 = scmp.lt.s32.totalorder %s3727_s22, %s3723_s8 }
 0x122   :  { %p3730_p4 = por %p3729_p3, %p3728_p2 }
 0x124   :  { %p3731_p5 = pnand %p3730_p4, %p3724_p1 }
 0x126   :  { %3734 = shalt.err (!%p3731_p5)
}
 0x127   :  { %124 = dma.hbm_to_vmem [thread:$0]  %s4810_s10, 16, %s122_s6, [#allocation21]  }
 0x128   :  { %s4811_s1 = sld [smem:[#allocation63_spill]] }
 0x12e   :  { %s3735_s29 = scalar_lea.hbm %s4811_s1, 16 }
 0x12f   :  { %p3736_p6 = scmp.ne.s32.totalorder %s4811_s1, %s3735_s29  ;;  %p3739_p7 = scmp.lt.u32.totalorder %s3735_s29, %s4811_s1 }
 0x131   :  { %p3741_p8 = pnand %p3739_p7, %p3736_p6 }
 0x133   :  { %3744 = shalt.err (!%p3741_p8)
}
 0x134   :  { %s3745_s27 = scalar_lea.vmem %s144_s4, 16  ;;  %s3749_s30 = scalar_lea.vmem %s144_s4, 32 }
 0x135   :  { %p3746_p9 = scmp.ne.s32.totalorder %s144_s4, %s3745_s27  ;;  %p3750_p10 = scmp.lt.s32.totalorder %s144_s4, %s144_s4 }
 0x136   :  { %p3751_p11 = scmp.lt.s32.totalorder %s3749_s30, %s3745_s27 }
 0x138   :  { %p3752_p12 = por %p3751_p11, %p3750_p10 }
 0x13a   :  { %p3753_p13 = pnand %p3752_p12, %p3746_p9 }
 0x13c   :  { %3756 = shalt.err (!%p3753_p13)
}
 0x13d   :  { %146 = dma.hbm_to_vmem [thread:$0]  %s4811_s1, 16, %s144_s4, [#allocation24]  }
 0x13e   :  { %s3927_s9 = smov [#allocation28]   ;;  %s3928_s5 = smov [#allocation31]  }
 0x13f   :  { %s163_s26 = sshll.u32 %s3927_s9, 4  ;;  %s185_s8 = sshll.u32 %s3928_s5, 4  ;;  %s164_s26 = int_to_ptr.vmem [resolvable:$true] %s163_s26  ;;  %s186_s8 = int_to_ptr.vmem [resolvable:$true] %s185_s8 }
 0x140   :  { %s3757_s24 = scalar_lea.hbm %s4759_s12, 16 }
 0x141   :  { %p3758_p0 = scmp.ne.s32.totalorder %s4759_s12, %s3757_s24  ;;  %p3761_p1 = scmp.lt.u32.totalorder %s3757_s24, %s4759_s12 }
 0x143   :  { %p3763_p2 = pnand %p3761_p1, %p3758_p0 }
 0x145   :  { %3766 = shalt.err (!%p3763_p2)
}
 0x146   :  { %s3767_s4 = scalar_lea.vmem %s164_s26, 16  ;;  %s3771_s1 = scalar_lea.vmem %s164_s26, 32 }
 0x147   :  { %p3768_p3 = scmp.ne.s32.totalorder %s164_s26, %s3767_s4  ;;  %p3772_p4 = scmp.lt.s32.totalorder %s164_s26, %s164_s26 }
 0x148   :  { %p3773_p5 = scmp.lt.s32.totalorder %s3771_s1, %s3767_s4 }
 0x14a   :  { %p3774_p6 = por %p3773_p5, %p3772_p4 }
 0x14c   :  { %p3775_p7 = pnand %p3774_p6, %p3768_p3 }
 0x14e   :  { %3778 = shalt.err (!%p3775_p7)
}
 0x14f   :  { %166 = dma.hbm_to_vmem [thread:$0]  %s4759_s12, 16, %s164_s26, [#allocation27]  }
 0x150   :  { %s3779_s30 = scalar_lea.hbm %s4761_s14, 16 }
 0x151   :  { %p3780_p8 = scmp.ne.s32.totalorder %s4761_s14, %s3779_s30  ;;  %p3783_p9 = scmp.lt.u32.totalorder %s3779_s30, %s4761_s14 }
 0x153   :  { %p3785_p10 = pnand %p3783_p9, %p3780_p8 }
 0x155   :  { %3788 = shalt.err (!%p3785_p10)
}
 0x156   :  { %s3789_s22 = scalar_lea.vmem %s186_s8, 16  ;;  %s3793_s18 = scalar_lea.vmem %s186_s8, 32 }
 0x157   :  { %p3790_p11 = scmp.ne.s32.totalorder %s186_s8, %s3789_s22  ;;  %p3794_p12 = scmp.lt.s32.totalorder %s186_s8, %s186_s8 }
 0x158   :  { %p3795_p13 = scmp.lt.s32.totalorder %s3793_s18, %s3789_s22 }
 0x15a   :  { %p3796_p0 = por %p3795_p13, %p3794_p12 }
 0x15c   :  { %p3797_p1 = pnand %p3796_p0, %p3790_p11 }
 0x15e   :  { %3800 = shalt.err (!%p3797_p1)
}
 0x15f   :  { %188 = dma.hbm_to_vmem [thread:$0]  %s4761_s14, 16, %s186_s8, [#allocation30]  }
 0x160   :  { %s3929_s24 = smov [#allocation34]   ;;  %s3930_s0 = smov [#allocation37]  }
 0x161   :  { %s206_s11 = sshll.u32 %s3929_s24, 4  ;;  %s231_s29 = sshll.u32 %s3930_s0, 4  ;;  %s207_s11 = int_to_ptr.vmem [resolvable:$true] %s206_s11  ;;  %s232_s29 = int_to_ptr.vmem [resolvable:$true] %s231_s29 }
 0x162   :  { %s3801_s1 = scalar_lea.hbm %s4764_s17, 128 }
 0x163   :  { %p3802_p2 = scmp.ne.s32.totalorder %s4764_s17, %s3801_s1  ;;  %p3805_p3 = scmp.lt.u32.totalorder %s3801_s1, %s4764_s17 }
 0x165   :  { %p3807_p4 = pnand %p3805_p3, %p3802_p2 }
 0x167   :  { %3810 = shalt.err (!%p3807_p4)
}
 0x168   :  { %s3811_s14 = scalar_lea.vmem %s207_s11, 128  ;;  %p3816_p6 = scmp.lt.s32.totalorder %s207_s11, %s207_s11 }
 0x169   :  { %p3812_p5 = scmp.ne.s32.totalorder %s207_s11, %s3811_s14  ;;  %p3817_p7 = scmp.lt.s32.totalorder %s3811_s14, %s3811_s14 }
 0x16b   :  { %p3818_p8 = por %p3817_p7, %p3816_p6 }
 0x16d   :  { %p3819_p9 = pnand %p3818_p8, %p3812_p5 }
 0x16f   :  { %3822 = shalt.err (!%p3819_p9)
}
 0x170   :  { %212 = dma.hbm_to_vmem [thread:$0]  %s4764_s17, 128, %s207_s11, [#allocation33], %s3913_s2, %s3913_s2, %s3914_s3  }
 0x171   :  { %s3823_s9 = scalar_lea.hbm %s4767_s20, 16 }
 0x172   :  { %p3824_p10 = scmp.ne.s32.totalorder %s4767_s20, %s3823_s9  ;;  %p3827_p11 = scmp.lt.u32.totalorder %s3823_s9, %s4767_s20 }
 0x174   :  { %p3829_p12 = pnand %p3827_p11, %p3824_p10 }
 0x176   :  { %3832 = shalt.err (!%p3829_p12)
}
 0x177   :  { %s3833_s26 = scalar_lea.vmem %s232_s29, 16  ;;  %s3837_s24 = scalar_lea.vmem %s232_s29, 32 }
 0x178   :  { %p3834_p13 = scmp.ne.s32.totalorder %s232_s29, %s3833_s26  ;;  %p3838_p0 = scmp.lt.s32.totalorder %s232_s29, %s232_s29 }
 0x179   :  { %p3839_p1 = scmp.lt.s32.totalorder %s3837_s24, %s3833_s26 }
 0x17b   :  { %p3840_p2 = por %p3839_p1, %p3838_p0 }
 0x17d   :  { %p3841_p3 = pnand %p3840_p2, %p3834_p13 }
 0x17f   :  { %3844 = shalt.err (!%p3841_p3)
}
 0x180   :  { %234 = dma.hbm_to_vmem [thread:$0]  %s4767_s20, 16, %s232_s29, [#allocation36]  }
 0x181   :  { %s3931_s0 = smov [#allocation40]   ;;  %s3845_s7 = scalar_lea.hbm %s4770_s23, 256 }
 0x182   :  { %s252_s28 = sshll.u32 %s3931_s0, 4  ;;  %p3846_p4 = scmp.ne.s32.totalorder %s4770_s23, %s3845_s7  ;;  %s253_s28 = int_to_ptr.vmem [resolvable:$true] %s252_s28 }
 0x183   :  { %p3849_p5 = scmp.lt.u32.totalorder %s3845_s7, %s4770_s23 }
 0x185   :  { %p3851_p6 = pnand %p3849_p5, %p3846_p4 }
 0x187   :  { %3854 = shalt.err (!%p3851_p6)
}
 0x188   :  { %s3855_s8 = scalar_lea.vmem %s253_s28, 256  ;;  %p3860_p8 = scmp.lt.s32.totalorder %s253_s28, %s253_s28 }
 0x189   :  { %p3856_p7 = scmp.ne.s32.totalorder %s253_s28, %s3855_s8  ;;  %p3861_p9 = scmp.lt.s32.totalorder %s3855_s8, %s3855_s8 }
 0x18b   :  { %p3862_p10 = por %p3861_p9, %p3860_p8 }
 0x18d   :  { %p3863_p11 = pnand %p3862_p10, %p3856_p7 }
 0x18f   :  { %3866 = shalt.err (!%p3863_p11)
}
 0x190   :  { %258 = dma.hbm_to_vmem [thread:$0]  %s4770_s23, 256, %s253_s28, [#allocation39], %s3913_s2, %s3913_s2, %s3914_s3  }
 0x191   :  { %3889 = dma.done.wait [#allocation12], 192  }
 0x192   :  { %3890 = vsyncadd [#allocation12], 4294967104 }
 0x193   :  { %3891 = dma.done.wait [#allocation15], 208  }
 0x194   :  { %3892 = vsyncadd [#allocation15], 4294967088 }
 0x195   :  { %3893 = dma.done.wait [#allocation18], 208  }
 0x196   :  { %3894 = vsyncadd [#allocation18], 4294967088 }
 0x197   :  { %3895 = dma.done.wait [#allocation21], 208  }
 0x198   :  { %3896 = vsyncadd [#allocation21], 4294967088 }
 0x199   :  { %3897 = dma.done.wait [#allocation24], 400  }
 0x19a   :  { %3898 = vsyncadd [#allocation24], 4294966896 }
 0x19b   :  { %3899 = dma.done.wait [#allocation27], 80  }
 0x19c   :  { %3900 = vsyncadd [#allocation27], 4294967216 }
 0x19d   :  { %3901 = dma.done.wait [#allocation30], 400  }
 0x19e   :  { %3902 = vsyncadd [#allocation30], 4294966896 }
 0x19f   :  { %3903 = dma.done.wait [#allocation33], 144  }
 0x1a0   :  { %3904 = vsyncadd [#allocation33], 4294967152 }
 0x1a1   :  { %3905 = dma.done.wait [#allocation36], 32  }
 0x1a2   :  { %3906 = vsyncadd [#allocation36], 4294967264 }
 0x1a3   :  { %3907 = dma.done.wait [#allocation39], 272  }
 0x1a4   :  { %3908 = vsyncadd [#allocation39], 4294967024  ;;  %vm358_vm0 = vcmask 1042432   ;;  %vm327_vm1 = vcmask 49152   ;;  %vm359_vm2 = vcmask 1043456   ;;  %v3932_v0 = vmov 65535  }
 0x1a5   :  { %v360_v1 = vsel %vm358_vm0, 4294967295, %v3932_v0  ;;  %v3933_v2 = vmov 0.0   ;;  %vm332_vm3 = vcmask 56320   ;;  %v349_v4 = vld [vmem:[#allocation11 + $0x4] sm:$0xf]  ;;  %s4812_s3 = sld [smem:[#allocation53_spill]] }
 0x1a6   :  { %328 = vst.msk [vmem:[#allocation2] sm:$0x1] %vm327_vm1, %v3933_v2  ;;  %329 = vst.msk [vmem:[#allocation2 + $0x18] sm:$0x1] %vm327_vm1, %v3933_v2  ;;  %v361_v3 = vsel %vm359_vm2, %v360_v1, 0  ;;  %vm557_vm4 = vcmask 57344  }
 0x1a7   :  { %330 = vst.msk [vmem:[#allocation2 + $0x11] sm:$0x1] %vm327_vm1, %v3933_v2  ;;  %331 = vst.msk [vmem:[#allocation2 + $0x29] sm:$0x1] %vm327_vm1, %v3933_v2  ;;  %v363_v7 = vand.u32 %v361_v3, %v349_v4  ;;  %v341_v8 = vld [vmem:[#allocation11] sm:$0xf] }
 0x1a8   :  { %v421_v11 = vand.u32 %v361_v3, %v341_v8  ;;  %v477_v12 = vld [vmem:[#allocation11 + $0x8] sm:$0xf]  ;;  %558 = vst.msk [vmem:[#allocation3] sm:$0x1] %vm557_vm4, %v3933_v2  ;;  %559 = vst.msk [vmem:[#allocation3 + $0x18] sm:$0x1] %vm557_vm4, %v3933_v2 }
 0x1a9   :  { %3083 = vmatprep.subr.bf16.mxu0 %v363_v7  ;;  %v487_v22 = vand.u32 %v477_v12, %v361_v3  ;;  %560 = vst.msk [vmem:[#allocation3 + $0x11] sm:$0x1] %vm557_vm4, %v3933_v2  ;;  %561 = vst.msk [vmem:[#allocation3 + $0x29] sm:$0x1] %vm557_vm4, %v3933_v2  ;;  %v579_v32 = vld [vmem:[#allocation14 + $0x4] sm:$0xf] }
 0x1aa   :  { %3084 = vmatpush3.bf16.msra.mxu0 %v363_v7  ;;  %783 = vst.msk [vmem:[#allocation4] sm:$0x1] %vm557_vm4, %v3933_v2  ;;  %784 = vst.msk [vmem:[#allocation4 + $0x18] sm:$0x1] %vm557_vm4, %v3933_v2  ;;  %3382 = vmatprep.subr.msk.bf16.mxu1 %vm359_vm2, %v579_v32  ;;  %v589_v33 = vsel %vm359_vm2, %v579_v32, 0  ;;  %s4813_s26 = sld [smem:[#allocation55_spill]] }
 0x1ab   :  { %v323_v5 = vld [vmem:[%s4812_s3] sm:$0xff]  ;;  %v324_v6 = vld [vmem:[%s4812_s3 + $0x8] sm:$0xff]  ;;  %v325_v9 = vld [vmem:[%s4812_s3 + $0x10] sm:$0xff]  ;;  %3089 = vmatprep.subr.bf16.mxu0 %v421_v11  ;;  %785 = vst.msk [vmem:[#allocation4 + $0x11] sm:$0x1] %vm557_vm4, %v3933_v2  ;;  %3102 = vmatpush3.bf16.msra.mxu1 %v589_v33  ;;  %vm562_vm5 = vcmask 64512  }
 0x1ac   :  { %333 = vst.msk [vmem:[#allocation2 + $0x1] sm:$0xff] %vm332_vm3, %v323_v5  ;;  %334 = vst.msk [vmem:[#allocation2 + $0x9] sm:$0xff] %vm332_vm3, %v324_v6  ;;  %v326_v10 = vld [vmem:[%s4812_s3 + $0x18] sm:$0xff]  ;;  %v571_v34 = vld [vmem:[#allocation14] sm:$0xf]  ;;  %vm3934_vm6 = vmmov 0  }
 0x1ad   :  { %335 = vst.msk [vmem:[#allocation2 + $0x19] sm:$0xff] %vm332_vm3, %v325_v9  ;;  %336 = vst.msk [vmem:[#allocation2 + $0x21] sm:$0xff] %vm332_vm3, %v326_v10  ;;  %3383 = vmatprep.subr.msk.bf16.mxu1 %vm359_vm2, %v571_v34  ;;  %v647_v55 = vsel %vm359_vm2, %v571_v34, 0  ;;  %v703_v58 = vld [vmem:[#allocation14 + $0x8] sm:$0xf]  ;;  %vm1262_vm7 = vcmask 122880  }
 0x1ae   :  { %786 = vst.msk [vmem:[#allocation4 + $0x29] sm:$0x1] %vm557_vm4, %v3933_v2  ;;  %1011 = vst.msk [vmem:[#allocation5] sm:$0x1] %vm557_vm4, %v3933_v2  ;;  %v713_v0 = vsel %vm359_vm2, %v703_v58, 0  ;;  %vm1267_vm8 = vcmask 130048  }
 0x1af   :  { %1012 = vst.msk [vmem:[#allocation5 + $0x18] sm:$0x1] %vm557_vm4, %v3933_v2  ;;  %v803_v6 = vld [vmem:[#allocation17 + $0x4] sm:$0xf]  ;;  %v795_v8 = vld [vmem:[#allocation17] sm:$0xf] }
 0x1b0   :  { %v2853_v35 = vld [vmem:[%s4813_s26] ss:$0 sm:$0xff]  ;;  %v813_v7 = vsel %vm359_vm2, %v803_v6, 0  ;;  %v927_v32 = vld [vmem:[#allocation17 + $0x8] sm:$0xf]  ;;  %vm1756_vm9 = vcmask 253952  }
 0x1b1   :  { %v2860_v9 = vld [vmem:[#allocation16] ss:$0 sm:$0xff]  ;;  %1263 = vst.msk [vmem:[#allocation6] sm:$0x1] %vm1262_vm7, %v3933_v2  ;;  %1264 = vst.msk [vmem:[#allocation6 + $0x10] sm:$0x1] %vm1262_vm7, %v3933_v2 }
 0x1b2   :  { %1265 = vst.msk [vmem:[#allocation6 + $0x9] sm:$0x1] %vm1262_vm7, %v3933_v2  ;;  %1266 = vst.msk [vmem:[#allocation6 + $0x19] sm:$0x1] %vm1262_vm7, %v3933_v2  ;;  %vm1761_vm10 = vcmask 257024   ;;  %vm1803_vm11 = vcmask 261120  }
 0x1b3   :  { %v344_v13 = vld [vmem:[#allocation2 + $0x1] sm:$0xff]  ;;  %v345_v14 = vld [vmem:[#allocation2 + $0x9] sm:$0xff]  ;;  %1470 = vst.msk [vmem:[#allocation7] sm:$0x1] %vm1262_vm7, %v3933_v2  ;;  %1471 = vst.msk [vmem:[#allocation7 + $0x10] sm:$0x1] %vm1262_vm7, %v3933_v2 }
 0x1b4   :  { %v337_v15 = vld [vmem:[#allocation2] sm:$0xff]  ;;  %v350_v16 = vpack.c.bf16 %v345_v14, %v344_v13  ;;  %v338_v19 = vld [vmem:[#allocation2 + $0x8] sm:$0xff]  ;;  %v339_v23 = vld [vmem:[#allocation2 + $0x18] sm:$0xff]  ;;  %1759 = vst.msk [vmem:[#allocation8 + $0x5] sm:$0x1] %vm1756_vm9, %v3933_v2  ;;  %vm2377_vm12 = vcmask 516096  }
 0x1b5   :  { %v346_v17 = vld [vmem:[#allocation2 + $0x19] sm:$0xff]  ;;  %v347_v18 = vld [vmem:[#allocation2 + $0x21] sm:$0xff]  ;;  %v342_v21 = vpack.c.bf16 %v338_v19, %v337_v15  ;;  %v473_v26 = vld [vmem:[#allocation2 + $0xa] sm:$0xff]  ;;  %1760 = vst.msk [vmem:[#allocation8 + $0xd] sm:$0x1] %vm1756_vm9, %v3933_v2  ;;  %vm2382_vm13 = vcmask 517120  }
 0x1b6   :  { %v351_v20 = vpack.c.bf16 %v347_v18, %v346_v17  ;;  %3085 = vmatprep.mubr.msk.bf16.mxu0 %vm332_vm3, %v350_v16  ;;  %v340_v24 = vld [vmem:[#allocation2 + $0x20] sm:$0xff]  ;;  %1757 = vst.msk [vmem:[#allocation8] sm:$0x1] %vm1756_vm9, %v3933_v2  ;;  %1758 = vst.msk [vmem:[#allocation8 + $0x8] sm:$0x1] %vm1756_vm9, %v3933_v2  ;;  %vm2451_vm14 = vcmask 523264  }
 0x1b7   :  { %v472_v25 = vld [vmem:[#allocation2 + $0x2] sm:$0xff]  ;;  %v343_v27 = vpack.c.bf16 %v340_v24, %v339_v23  ;;  %v474_v29 = vld [vmem:[#allocation2 + $0x1a] sm:$0xff]  ;;  %2007 = vst.msk [vmem:[#allocation9] sm:$0x1] %vm1756_vm9, %v3933_v2  ;;  %2008 = vst.msk [vmem:[#allocation9 + $0x8] sm:$0x1] %vm1756_vm9, %v3933_v2 }
 0x1b8   :  { %3086 = vmatmul.mubr.msk.bf16.vlgmr.msra.gmra.mrb[0].mxu0 %vm332_vm3, %v351_v20  ;;  %v478_v28 = vpack.c.bf16 %v473_v26, %v472_v25  ;;  %v475_v30 = vld [vmem:[#allocation2 + $0x22] sm:$0xff]  ;;  %2380 = vst.msk [vmem:[#allocation10 + $0x3] sm:$0x1] %vm2377_vm12, %v3933_v2  ;;  %2381 = vst.msk [vmem:[#allocation10 + $0x7] sm:$0x1] %vm2377_vm12, %v3933_v2  ;;  %s4814_s7 = sld [smem:[#allocation65_spill]] }
 0x1b9   :  { %3090 = vmatpush3.bf16.msra.mxu0 %v421_v11  ;;  %3091 = vmatprep.mubr.msk.bf16.mxu0 %vm332_vm3, %v342_v21  ;;  %v479_v31 = vpack.c.bf16 %v475_v30, %v474_v29  ;;  %v871_v29 = vsel %vm359_vm2, %v795_v8, 0  ;;  %2378 = vst.msk [vmem:[#allocation10] sm:$0x1] %vm2377_vm12, %v3933_v2  ;;  %2379 = vst.msk [vmem:[#allocation10 + $0x4] sm:$0x1] %vm2377_vm12, %v3933_v2  ;;  %vm2747_vm15 = vcmask 1041409  }
 0x1ba   :  { %3095 = vmatprep.subr.bf16.mxu0 %v487_v22  ;;  %s4815_s13 = sld [smem:[#allocation66_spill]]  ;;  %s3938_s27 = smov [#allocation41]   ;;  %vm2821_vm0 = vcmask 123904  }
 0x1bb   :  { %s2829_s14 = sshll.u32 %s3938_s27, 4  ;;  %s2830_s14 = int_to_ptr.vmem [resolvable:$true] %s2829_s14 }
 0x1bc   :  { %p3872_p13 = scmp.lt.s32.totalorder %s2830_s14, %s2830_s14 }
 0x1c4   :  { %3092 = vmatmul.mubr.msk.bf16.vlgmr.msra.gmra.mrb[0].mxu0 %vm332_vm3, %v343_v27 }
 0x1c5   :  { %3096 = vmatpush3.bf16.msra.mxu0 %v487_v22  ;;  %3097 = vmatprep.mubr.msk.bf16.mxu0 %vm332_vm3, %v478_v28 }
 0x1c6   :  { %3385 = vmatprep.subr.msk.bf16.mxu0 %vm359_vm2, %v803_v6 }
 0x1d0   :  { %3098 = vmatmul.mubr.msk.bf16.vlgmr.msra.gmra.mrb[0].mxu0 %vm332_vm3, %v479_v31 }
 0x1d1   :  { %3120 = vmatpush3.bf16.msra.mxu0 %v813_v7 }
 0x1d2   :  { %3386 = vmatprep.subr.msk.bf16.mxu0 %vm359_vm2, %v795_v8 }
 0x2a3   :  { %v3099_v36 = vpop.f32.mrb[0].mxu0 }
 0x2a4   :  { %v4402_v37 = vadd.f32 %v3099_v36, %v2853_v35  ;;  %v523_v38 = vpop.f32.mrb[1].mxu0 }
 0x2a5   :  { %v4404_v39 = vadd.f32 %v2853_v35, %v523_v38  ;;  %v3100_v40 = vpop.f32.mrb[2].mxu0 }
 0x2a6   :  { %v555_v41 = vmax.f32 %v4402_v37, 0.0  ;;  %v4407_v42 = vadd.f32 %v3100_v40, %v2853_v35  ;;  %v526_v43 = vpop.f32.mrb[3].mxu0  ;;  %v937_v40 = vsel %vm359_vm2, %v927_v32, 0 }
 0x2a7   :  { %v553_v44 = vmax.f32 %v4404_v39, 0.0  ;;  %v4410_v45 = vadd.f32 %v2853_v35, %v526_v43  ;;  %v1022_v39 = vld [vmem:[#allocation20] sm:$0xf] }
 0x2a8   :  { %565 = vst.msk [vmem:[#allocation3 + $0x19] sm:$0xff] %vm562_vm5, %v555_v41  ;;  %v556_v46 = vmax.f32 %v4407_v42, 0.0  ;;  %v1094_v42 = vsel %vm359_vm2, %v1022_v39, 0 }
 0x2a9   :  { %563 = vst.msk [vmem:[#allocation3 + $0x1] sm:$0xff] %vm562_vm5, %v553_v44  ;;  %v554_v47 = vmax.f32 %v4410_v45, 0.0 }
 0x2aa   :  { %566 = vst.msk [vmem:[#allocation3 + $0x21] sm:$0xff] %vm562_vm5, %v556_v46 }
 0x2ab   :  { %564 = vst.msk [vmem:[#allocation3 + $0x9] sm:$0xff] %vm562_vm5, %v554_v47 }
 0x2af   :  { %v576_v53 = vld [vmem:[#allocation3 + $0x19] sm:$0xff] }
 0x2b0   :  { %v574_v49 = vld [vmem:[#allocation3 + $0x1] sm:$0xff]  ;;  %v569_v62 = vld [vmem:[#allocation3 + $0x18] sm:$0xff] }
 0x2b1   :  { %v577_v48 = vld [vmem:[#allocation3 + $0x21] sm:$0xff] }
 0x2b2   :  { %v575_v50 = vld [vmem:[#allocation3 + $0x9] sm:$0xff]  ;;  %v581_v54 = vpack.c.bf16 %v577_v48, %v576_v53  ;;  %v567_v56 = vld [vmem:[#allocation3] sm:$0xff] }
 0x2b3   :  { %v568_v51 = vld [vmem:[#allocation3 + $0x8] sm:$0xff]  ;;  %v580_v52 = vpack.c.bf16 %v575_v50, %v574_v49  ;;  %v570_v59 = vld [vmem:[#allocation3 + $0x20] sm:$0xff] }
 0x2b4   :  { %v572_v57 = vpack.c.bf16 %v568_v51, %v567_v56  ;;  %v698_v60 = vld [vmem:[#allocation3 + $0x2] sm:$0xff]  ;;  %v699_v61 = vld [vmem:[#allocation3 + $0xa] sm:$0xff]  ;;  %v573_v63 = vpack.c.bf16 %v570_v59, %v569_v62  ;;  %v700_v3 = vld [vmem:[#allocation3 + $0x1a] sm:$0xff] }
 0x2b5   :  { %3103 = vmatprep.mubr.msk.bf16.mxu1 %vm562_vm5, %v580_v52  ;;  %v704_v1 = vpack.c.bf16 %v699_v61, %v698_v60  ;;  %v701_v4 = vld [vmem:[#allocation3 + $0x22] sm:$0xff] }
 0x2b6   :  { %3104 = vmatmul.mubr.msk.bf16.vlgmr.msra.gmra.mrb[0].mxu1 %vm562_vm5, %v581_v54  ;;  %v705_v5 = vpack.c.bf16 %v701_v4, %v700_v3  ;;  %v1030_v51 = vld [vmem:[#allocation20 + $0x4] sm:$0xf]  ;;  %v1210_v52 = vld [vmem:[#allocation26] sm:$0xf] }
 0x2b7   :  { %3108 = vmatpush3.bf16.msra.mxu1 %v647_v55  ;;  %3109 = vmatprep.mubr.msk.bf16.mxu1 %vm562_vm5, %v572_v57  ;;  %v1042_v53 = vsel %vm359_vm2, %v1030_v51, 0  ;;  %v1219_v54 = vsel %vm359_vm2, %v1210_v52, 0  ;;  %v2867_v55 = vld [vmem:[#allocation19] ss:$0 sm:$0xff] }
 0x2b8   :  { %3384 = vmatprep.subr.msk.bf16.mxu1 %vm359_vm2, %v703_v58 }
 0x2c2   :  { %3110 = vmatmul.mubr.msk.bf16.vlgmr.msra.gmra.mrb[0].mxu1 %vm562_vm5, %v573_v63 }
 0x2c3   :  { %3114 = vmatpush3.bf16.msra.mxu1 %v713_v0  ;;  %3115 = vmatprep.mubr.msk.bf16.mxu1 %vm562_vm5, %v704_v1 }
 0x2c4   :  { %3137 = vmatprep.subr.bf16.mxu1 %v3933_v2 }
 0x2ce   :  { %3116 = vmatmul.mubr.msk.bf16.vlgmr.msra.gmra.mrb[0].mxu1 %vm562_vm5, %v705_v5 }
 0x2cf   :  { %3139 = vmatprep.mubr.msk.bf16.mxu1 %vm3934_vm6, %v3933_v2  ;;  %3138 = vmatpush3.bf16.msra.mxu1 %v1042_v53 }
 0x2d0   :  { %3143 = vmatprep.subr.bf16.mxu1 %v3933_v2 }
 0x3a1   :  { %v3117_v10 = vpop.f32.mrb[0].mxu1 }
 0x3a2   :  { %v777_v11 = vadd.f32 %v3117_v10, %v2860_v9  ;;  %v749_v12 = vpop.f32.mrb[1].mxu1 }
 0x3a3   :  { %v775_v13 = vadd.f32 %v2860_v9, %v749_v12  ;;  %v3118_v14 = vpop.f32.mrb[2].mxu1 }
 0x3a4   :  { %v781_v15 = vmax.f32 %v777_v11, 0.0  ;;  %v778_v16 = vadd.f32 %v3118_v14, %v2860_v9  ;;  %v752_v17 = vpop.f32.mrb[3].mxu1  ;;  %v3416_v14 = vld [vmem:[#allocation23 + $0x8] sm:$0xff]  }
 0x3a5   :  { %v779_v18 = vmax.f32 %v775_v13, 0.0  ;;  %v776_v19 = vadd.f32 %v2860_v9, %v752_v17 }
 0x3a6   :  { %789 = vst.msk [vmem:[#allocation4 + $0x19] sm:$0xff] %vm562_vm5, %v781_v15  ;;  %v782_v20 = vmax.f32 %v778_v16, 0.0 }
 0x3a7   :  { %787 = vst.msk [vmem:[#allocation4 + $0x1] sm:$0xff] %vm562_vm5, %v779_v18  ;;  %v780_v21 = vmax.f32 %v776_v19, 0.0 }
 0x3a8   :  { %790 = vst.msk [vmem:[#allocation4 + $0x21] sm:$0xff] %vm562_vm5, %v782_v20 }
 0x3a9   :  { %788 = vst.msk [vmem:[#allocation4 + $0x9] sm:$0xff] %vm562_vm5, %v780_v21 }
 0x3ad   :  { %v800_v27 = vld [vmem:[#allocation4 + $0x19] sm:$0xff] }
 0x3ae   :  { %v798_v23 = vld [vmem:[#allocation4 + $0x1] sm:$0xff]  ;;  %v793_v36 = vld [vmem:[#allocation4 + $0x18] sm:$0xff] }
 0x3af   :  { %v801_v22 = vld [vmem:[#allocation4 + $0x21] sm:$0xff] }
 0x3b0   :  { %v799_v24 = vld [vmem:[#allocation4 + $0x9] sm:$0xff]  ;;  %v805_v28 = vpack.c.bf16 %v801_v22, %v800_v27  ;;  %v791_v30 = vld [vmem:[#allocation4] sm:$0xff] }
 0x3b1   :  { %v792_v25 = vld [vmem:[#allocation4 + $0x8] sm:$0xff]  ;;  %v804_v26 = vpack.c.bf16 %v799_v24, %v798_v23  ;;  %v794_v33 = vld [vmem:[#allocation4 + $0x20] sm:$0xff] }
 0x3b2   :  { %v796_v31 = vpack.c.bf16 %v792_v25, %v791_v30  ;;  %v922_v34 = vld [vmem:[#allocation4 + $0x2] sm:$0xff]  ;;  %v923_v35 = vld [vmem:[#allocation4 + $0xa] sm:$0xff]  ;;  %v797_v38 = vpack.c.bf16 %v794_v33, %v793_v36  ;;  %v924_v48 = vld [vmem:[#allocation4 + $0x1a] sm:$0xff] }
 0x3b3   :  { %3121 = vmatprep.mubr.msk.bf16.mxu0 %vm562_vm5, %v804_v26  ;;  %v928_v43 = vpack.c.bf16 %v923_v35, %v922_v34  ;;  %v925_v49 = vld [vmem:[#allocation4 + $0x22] sm:$0xff]  ;;  %v2874_v26 = vld [vmem:[#allocation22] ss:$0 sm:$0xff] }
 0x3b4   :  { %3122 = vmatmul.mubr.msk.bf16.vlgmr.msra.gmra.mrb[4].mxu0 %vm562_vm5, %v805_v28  ;;  %v929_v50 = vpack.c.bf16 %v925_v49, %v924_v48 }
 0x3b5   :  { %3126 = vmatpush3.bf16.msra.mxu0 %v871_v29  ;;  %3127 = vmatprep.mubr.msk.bf16.mxu0 %vm562_vm5, %v796_v31 }
 0x3b6   :  { %3387 = vmatprep.subr.msk.bf16.mxu0 %vm359_vm2, %v927_v32 }
 0x3c0   :  { %3128 = vmatmul.mubr.msk.bf16.vlgmr.msra.gmra.mrb[4].mxu0 %vm562_vm5, %v797_v38 }
 0x3c1   :  { %3132 = vmatpush3.bf16.msra.mxu0 %v937_v40  ;;  %3133 = vmatprep.mubr.msk.bf16.mxu0 %vm562_vm5, %v928_v43  ;;  %v3417_v40 = vld [vmem:[#allocation23] sm:$0xff]  }
 0x3c2   :  { %3155 = vmatprep.subr.bf16.mxu0 %v3933_v2 }
 0x3cc   :  { %3134 = vmatmul.mubr.msk.bf16.vlgmr.msra.gmra.mrb[4].mxu0 %vm562_vm5, %v929_v50  ;;  %v3418_v50 = vld [vmem:[#allocation23 + $0x10] sm:$0xff]  }
 0x3cd   :  { %3157 = vmatprep.mubr.msk.bf16.mxu0 %vm3934_vm6, %v3933_v2  ;;  %3156 = vmatpush3.bf16.msra.mxu0 %v1219_v54 }
 0x3ce   :  { %3161 = vmatprep.subr.bf16.mxu0 %v3933_v2 }
 0x49f   :  { %v3135_v56 = vpop.f32.mrb[4].mxu0 }
 0x4a0   :  { %v1001_v57 = vadd.f32 %v3135_v56, %v2867_v55  ;;  %v973_v58 = vpop.f32.mrb[5].mxu0  ;;  %v2875_v56 = vld [vmem:[#allocation28] ss:$0 sm:$0xff] }
 0x4a1   :  { %v999_v59 = vadd.f32 %v2867_v55, %v973_v58  ;;  %v3136_v60 = vpop.f32.mrb[6].mxu0  ;;  %v2886_v58 = vld [vmem:[#allocation25] ss:$0 sm:$0xff] }
 0x4a2   :  { %v1005_v61 = vadd.f32 %v1001_v57, %v555_v41  ;;  %v1002_v62 = vadd.f32 %v3136_v60, %v2867_v55  ;;  %v976_v63 = vpop.f32.mrb[7].mxu0 }
 0x4a3   :  { %v1003_v0 = vadd.f32 %v999_v59, %v553_v44  ;;  %v1000_v1 = vadd.f32 %v2867_v55, %v976_v63  ;;  %v3419_v55 = vld [vmem:[#allocation29 + $0x8] sm:$0xff]  }
 0x4a4   :  { %v1009_v3 = vmax.f32 %v1005_v61, 0.0  ;;  %v1006_v4 = vadd.f32 %v1002_v62, %v556_v46 }
 0x4a5   :  { %v1007_v5 = vmax.f32 %v1003_v0, 0.0  ;;  %v1004_v6 = vadd.f32 %v1000_v1, %v554_v47  ;;  %v1142_v47 = vld [vmem:[#allocation20 + $0x8] sm:$0xf] }
 0x4a6   :  { %1017 = vst.msk [vmem:[#allocation5 + $0x19] sm:$0xff] %vm562_vm5, %v1009_v3  ;;  %v1010_v7 = vmax.f32 %v1006_v4, 0.0  ;;  %v1154_v10 = vsel %vm359_vm2, %v1142_v47, 0 }
 0x4a7   :  { %1015 = vst.msk [vmem:[#allocation5 + $0x1] sm:$0xff] %vm562_vm5, %v1007_v5  ;;  %v1008_v37 = vmax.f32 %v1004_v6, 0.0  ;;  %v3935_v5 = vmov 1983009808  }
 0x4a8   :  { %1018 = vst.msk [vmem:[#allocation5 + $0x21] sm:$0xff] %vm562_vm5, %v1010_v7  ;;  %v1496_v6 = vunpack.c.l.s4 %v3935_v5  ;;  %v1498_v7 = vlaneseq  ;;  %v3432_v5 = vld [vmem:[%s4766_s19 + $0x28] sm:$0xff]  }
 0x4a9   :  { %1016 = vst.msk [vmem:[#allocation5 + $0x9] sm:$0xff] %vm562_vm5, %v1008_v37 }
 0x4aa   :  { %v1497_v37 = vunpack.c.0.s8 %v1496_v6  ;;  %v4512_v39 = vshrl.u32 %v1498_v7, 7 }
 0x4af   :  { %v1028_v41 = vld [vmem:[#allocation5 + $0x19] ss:$2 sm:$0xff]  ;;  %v1021_v46 = vld [vmem:[#allocation5 + $0x18] ss:$2 sm:$0xff] }
 0x4b0   :  { %v1026_v44 = vld [vmem:[#allocation5 + $0x1] ss:$2 sm:$0xff]  ;;  %v1019_v45 = vld [vmem:[#allocation5] ss:$2 sm:$0xff] }
 0x4b1   :  { %v2983_v8 = vpack.c.bf16 %v1028_v41, %v1026_v44  ;;  %v2984_v9 = vpack.c.bf16 %v1021_v46, %v1019_v45  ;;  %v1138_v11 = vld [vmem:[#allocation5 + $0x2] ss:$2 sm:$0xff]  ;;  %v4515_v41 = vsub.s32 %v1497_v37, %v4512_v39 }
 0x4b2   :  { %v1140_v12 = vld [vmem:[#allocation5 + $0x1a] ss:$2 sm:$0xff]  ;;  %v3420_v45 = vld [vmem:[#allocation29] sm:$0xff]  }
 0x4b3   :  { %3140 = vmatmul.mubr.msk.bf16.vlgmr.msra.gmra.mrb[4].mxu1 %vm562_vm5, %v2983_v8  ;;  %3158 = vmatmul.mubr.msk.bf16.vlgmr.msra.gmra.mrb[8].mxu0 %vm562_vm5, %v2983_v8  ;;  %v2985_v13 = vpack.c.bf16 %v1140_v12, %v1138_v11  ;;  %v3421_v11 = vld [vmem:[#allocation29 + $0x10] sm:$0xff]  }
 0x4b4   :  { %3144 = vmatpush3.bf16.msra.mxu1 %v1094_v42  ;;  %3145 = vmatprep.mubr.msk.bf16.mxu1 %vm3934_vm6, %v3933_v2 }
 0x4b5   :  { %3149 = vmatprep.subr.bf16.mxu1 %v3933_v2  ;;  %3163 = vmatprep.mubr.msk.bf16.mxu0 %vm3934_vm6, %v3933_v2 }
 0x4b6   :  { %3162 = vmatpush3.bf16.msra.mxu0 %v3416_v14 }
 0x4b7   :  { %3167 = vmatprep.subr.bf16.mxu0 %v3933_v2 }
 0x4bb   :  { %3146 = vmatmul.mubr.msk.bf16.vlgmr.msra.gmra.mrb[8].mxu1 %vm562_vm5, %v2984_v9 }
 0x4bc   :  { %3150 = vmatpush3.bf16.msra.mxu1 %v1154_v10  ;;  %3151 = vmatprep.mubr.msk.bf16.mxu1 %vm3934_vm6, %v3933_v2 }
 0x4bd   :  { %3179 = vmatprep.subr.bf16.mxu1 %v3933_v2 }
 0x4c3   :  { %3152 = vmatmul.mubr.msk.bf16.vlgmr.msra.gmra.mrb[12].mxu1 %vm562_vm5, %v2985_v13 }
 0x4c4   :  { %3181 = vmatprep.mubr.msk.bf16.mxu1 %vm3934_vm6, %v3933_v2  ;;  %3180 = vmatpush3.bf16.msra.mxu1 %v3419_v55 }
 0x4c5   :  { %3185 = vmatprep.subr.bf16.mxu1 %v3933_v2 }
 0x586   :  { %v1078_v15 = vpop.f32.mrb[4].mxu1 }
 0x587   :  { %v3141_v16 = vpop.f32.mrb[5].mxu1 }
 0x588   :  { %v1081_v17 = vpop.f32.mrb[6].mxu1  ;;  %v3422_v16 = vld [vmem:[#allocation34] sm:$0xff]  }
 0x589   :  { %v3142_v18 = vpop.f32.mrb[7].mxu1 }
 0x58a   :  { %v3423_v18 = vld [vmem:[%s4762_s15 + $0x10] sm:$0xff]  }
 0x58e   :  { %v1130_v19 = vpop.f32.mrb[8].mxu1 }
 0x58f   :  { %v1131_v20 = vadd.f32 %v1130_v19, %v1078_v15  ;;  %v3147_v21 = vpop.f32.mrb[9].mxu1  ;;  %v3424_v19 = vld [vmem:[%s4762_s15 + $0x20] sm:$0xff]  }
 0x590   :  { %v1133_v22 = vpop.f32.mrb[10].mxu1  ;;  %v3426_v21 = vld [vmem:[%s4762_s15 + $0x28] sm:$0xff]  }
 0x591   :  { %v1134_v23 = vadd.f32 %v1133_v22, %v1081_v17  ;;  %v3148_v24 = vpop.f32.mrb[11].mxu1 }
 0x596   :  { %v1190_v25 = vpop.f32.mrb[12].mxu1 }
 0x597   :  { %v1197_v27 = vadd.f32 %v1190_v25, %v1131_v20  ;;  %v3153_v28 = vpop.f32.mrb[13].mxu1  ;;  %v3425_v20 = vld [vmem:[%s4762_s15 + $0x18] sm:$0xff]  }
 0x598   :  { %v1193_v29 = vpop.f32.mrb[14].mxu1 }
 0x599   :  { %v1206_v30 = vadd.f32 %v2874_v26, %v1197_v27  ;;  %v1198_v31 = vadd.f32 %v1193_v29, %v1134_v23  ;;  %v3154_v32 = vpop.f32.mrb[15].mxu1  ;;  %v2896_v27 = vld [vmem:[#allocation31] ss:$0 sm:$0xff] }
 0x59b   :  { %v1208_v33 = vmax.f32 %v1206_v30, 0.0  ;;  %v1207_v34 = vadd.f32 %v2874_v26, %v1198_v31 }
 0x59d   :  { %1268 = vst.msk [vmem:[#allocation6 + $0x1] sm:$0xff] %vm1267_vm8, %v1208_v33  ;;  %v1209_v35 = vmax.f32 %v1207_v34, 0.0 }
 0x59f   :  { %1269 = vst.msk [vmem:[#allocation6 + $0x11] sm:$0xff] %vm1267_vm8, %v1209_v35 }
 0x5a4   :  { %v1276_v36 = vld [vmem:[#allocation6 + $0x1] sm:$0xff] }
 0x5a5   :  { %v1270_v49 = vld [vmem:[#allocation6] sm:$0xff] }
 0x5a6   :  { %v1277_v38 = vld [vmem:[#allocation6 + $0x11] sm:$0xff]  ;;  %v1393_v53 = vld [vmem:[#allocation6 + $0x2] sm:$0xff] }
 0x5a7   :  { %v2986_v43 = vpack.c.bf16 %v1277_v38, %v1276_v36  ;;  %v1271_v48 = vld [vmem:[#allocation6 + $0x10] sm:$0xff] }
 0x5a8   :  { %v2987_v51 = vpack.c.bf16 %v1271_v48, %v1270_v49  ;;  %v1394_v52 = vld [vmem:[#allocation6 + $0x12] sm:$0xff] }
 0x5a9   :  { %3164 = vmatmul.mubr.msk.bf16.vlgmr.msra.gmra.mrb[8].mxu0 %vm1267_vm8, %v2986_v43  ;;  %v2988_v54 = vpack.c.bf16 %v1394_v52, %v1393_v53 }
 0x5aa   :  { %3168 = vmatpush3.bf16.msra.mxu0 %v3417_v40  ;;  %3169 = vmatprep.mubr.msk.bf16.mxu0 %vm3934_vm6, %v3933_v2 }
 0x5ab   :  { %3173 = vmatprep.subr.bf16.mxu0 %v3933_v2 }
 0x5b5   :  { %3170 = vmatmul.mubr.msk.bf16.vlgmr.msra.gmra.mrb[8].mxu0 %vm1267_vm8, %v2987_v51 }
 0x5b6   :  { %3174 = vmatpush3.bf16.msra.mxu0 %v3418_v50  ;;  %3175 = vmatprep.mubr.msk.bf16.mxu0 %vm3934_vm6, %v3933_v2 }
 0x5b7   :  { %3203 = vmatprep.subr.bf16.mxu0 %v3933_v2 }
 0x5c1   :  { %3176 = vmatmul.mubr.msk.bf16.vlgmr.msra.gmra.mrb[8].mxu0 %vm1267_vm8, %v2988_v54 }
 0x5c2   :  { %3207 = vmatprep.mubr.msk.bf16.mxu0 %vm3934_vm6, %v3933_v2  ;;  %3204 = vmatpush3.bf16.msra.mxu0 %v3423_v18 }
 0x5c3   :  { %3205 = vmatprep.subr.bf16.mxu0 %v3933_v2 }
 0x5c6   :  { %3206 = vmatpush3.bf16.msra.mxu0 %v3425_v20 }
 0x5c7   :  { %3211 = vmatprep.subr.bf16.mxu0 %v3933_v2 }
 0x694   :  { %v1448_v57 = vpop.f32.mrb[8].mxu0 }
 0x695   :  { %v3326_v59 = vadd.f32 %v2875_v56, %v1448_v57  ;;  %v3177_v60 = vpop.f32.mrb[9].mxu0  ;;  %v3427_v57 = vld [vmem:[%s4762_s15] sm:$0xff]  }
 0x696   :  { %v1451_v61 = vpop.f32.mrb[10].mxu0  ;;  %v3428_v60 = vld [vmem:[%s4762_s15 + $0x8] sm:$0xff]   ;;  %s3867_s15 = scalar_lea.vmem %s2830_s14, 32 }
 0x697   :  { %v3327_v62 = vadd.f32 %v3326_v59, %v2886_v58  ;;  %v3328_v63 = vadd.f32 %v2875_v56, %v1451_v61  ;;  %v3178_v0 = vpop.f32.mrb[11].mxu0  ;;  %p3868_p12 = scmp.ne.s32.totalorder %s2830_s14, %s3867_s15  ;;  %p3873_p0 = scmp.lt.s32.totalorder %s3867_s15, %s3867_s15 }
 0x699   :  { %v1468_v1 = vmax.f32 %v3327_v62, 0.0  ;;  %v3329_v3 = vadd.f32 %v3328_v63, %v2886_v58  ;;  %p3874_p1 = por %p3873_p0, %p3872_p13 }
 0x69b   :  { %1474 = vst.msk [vmem:[#allocation7 + $0x1] sm:$0xff] %vm1267_vm8, %v1468_v1  ;;  %v1469_v4 = vmax.f32 %v3329_v3, 0.0  ;;  %v3429_v1 = vld [vmem:[%s4766_s19 + $0x10] sm:$0xff]   ;;  %v3430_v3 = vld [vmem:[%s4766_s19 + $0x20] sm:$0xff]   ;;  %p3875_p2 = pnand %p3874_p1, %p3868_p12 }
 0x69d   :  { %1475 = vst.msk [vmem:[#allocation7 + $0x11] sm:$0xff] %vm1267_vm8, %v1469_v4  ;;  %v3431_v4 = vld [vmem:[%s4766_s19 + $0x18] sm:$0xff]  }
 0x6a2   :  { %v1484_v44 = vld [vmem:[#allocation7 + $0x1] ss:$2 sm:$0xf]  ;;  %v1476_v9 = vld [vmem:[#allocation7] ss:$2 sm:$0xf] }
 0x6a3   :  { %v1614_v14 = vld [vmem:[#allocation7 + $0x2] ss:$2 sm:$0xf] }
 0x6a4   :  { %v1486_v8 = vld [vmem:[#allocation7 + $0x11] ss:$2 sm:$0xf]  ;;  %v1478_v47 = vld [vmem:[#allocation7 + $0x10] ss:$2 sm:$0xf] }
 0x6a5   :  { %v2887_v42 = vpack.c.bf16 %v1486_v8, %v1484_v44  ;;  %v2890_v10 = vpack.c.bf16 %v1478_v47, %v1476_v9  ;;  %v1616_v13 = vld [vmem:[#allocation7 + $0x12] ss:$2 sm:$0xf]  ;;  %v2897_v8 = vld [vmem:[#allocation35] ss:$0 sm:$0xff] }
 0x6a6   :  { %v2893_v15 = vpack.c.bf16 %v1616_v13, %v1614_v14 }
 0x6a7   :  { %v1501_v46 = vrot.slane %v2887_v42, %v4515_v41  ;;  %v1560_v12 = vrot.slane %v2890_v10, %v4515_v41  ;;  %v1711_v42 = vcombine.low %v2897_v8, %v2897_v8  ;;  %v2941_v8 = vld [vmem:[#allocation37] ss:$0 sm:$0xff] }
 0x6a8   :  { %v1631_v17 = vrot.slane %v2893_v15, %v4515_v41 }
 0x6a9   :  { %3182 = vmatmul.mubr.msk.bf16.vlgmr.msra.gmra.mrb[16].mxu1 %vm1267_vm8, %v1501_v46 }
 0x6aa   :  { %3186 = vmatpush3.bf16.msra.mxu1 %v3420_v45  ;;  %3187 = vmatprep.mubr.msk.bf16.mxu1 %vm3934_vm6, %v3933_v2 }
 0x6ab   :  { %3191 = vmatprep.subr.bf16.mxu1 %v3933_v2 }
 0x6b5   :  { %3188 = vmatmul.mubr.msk.bf16.vlgmr.msra.gmra.mrb[16].mxu1 %vm1267_vm8, %v1560_v12 }
 0x6b6   :  { %3192 = vmatpush3.bf16.msra.mxu1 %v3421_v11  ;;  %3193 = vmatprep.mubr.msk.bf16.mxu1 %vm3934_vm6, %v3933_v2 }
 0x6b7   :  { %3197 = vmatprep.subr.bf16.mxu1 %v3933_v2 }
 0x6bd   :  { %3194 = vmatmul.mubr.msk.bf16.vlgmr.msra.gmra.mrb[20].mxu1 %vm1267_vm8, %v1631_v17 }
 0x6be   :  { %3198 = vmatpush3.bf16.msra.mxu1 %v3422_v16  ;;  %3199 = vmatprep.mubr.msk.bf16.mxu1 %vm3934_vm6, %v3933_v2 }
 0x6bf   :  { %3219 = vmatprep.subr.bf16.mxu1 %v3933_v2 }
 0x6c5   :  { %3200 = vmatmul.mubr.msk.bf16.vlgmr.msra.gmra.mrb[24].mxu1 %vm1267_vm8, %v1501_v46  ;;  %v2920_v46 = vld [vmem:[#allocation32] ss:$0 sm:$0xff] }
 0x6c6   :  { %3223 = vmatprep.mubr.msk.bf16.mxu1 %vm3934_vm6, %v3933_v2  ;;  %3220 = vmatpush3.bf16.msra.mxu1 %v3424_v19 }
 0x6c7   :  { %3221 = vmatprep.subr.bf16.mxu1 %v3933_v2 }
 0x6ca   :  { %3222 = vmatpush3.bf16.msra.mxu1 %v3426_v21 }
 0x6cb   :  { %3227 = vmatprep.subr.bf16.mxu1 %v3933_v2 }
 0x788   :  { %v1604_v22 = vpop.f32.mrb[16].mxu1 }
 0x789   :  { %v3189_v23 = vpop.f32.mrb[17].mxu1  ;;  %v1611_v28 = vcombine.high %v1604_v22, %v1604_v22 }
 0x78a   :  { %v1607_v24 = vpop.f32.mrb[18].mxu1  ;;  %v3936_v23 = vmov 1966171168  }
 0x78b   :  { %v3190_v25 = vpop.f32.mrb[19].mxu1  ;;  %v2037_v24 = vunpack.c.l.s4 %v3936_v23  ;;  %v3445_v23 = vld [vmem:[%s4768_s21] sm:$0xff]  }
 0x78d   :  { %v2038_v25 = vunpack.c.0.s8 %v2037_v24 }
 0x790   :  { %v1675_v26 = vpop.f32.mrb[20].mxu1 }
 0x791   :  { %v1682_v29 = vcombine.high %v1675_v26, %v1675_v26  ;;  %v1684_v30 = vadd.f32 %v1675_v26, %v1604_v22  ;;  %v3195_v31 = vpop.f32.mrb[21].mxu1 }
 0x792   :  { %v1678_v32 = vpop.f32.mrb[22].mxu1 }
 0x793   :  { %v1685_v33 = vadd.f32 %v1682_v29, %v1611_v28  ;;  %v1693_v34 = vadd.f32 %v2896_v27, %v1684_v30  ;;  %v3196_v35 = vpop.f32.mrb[23].mxu1 }
 0x794   :  { %v3433_v35 = vld [vmem:[%s4766_s19] sm:$0xff]  }
 0x795   :  { %v1694_v36 = vadd.f32 %v2896_v27, %v1685_v33  ;;  %v1695_v38 = vmax.f32 %v1693_v34, 0.0  ;;  %v4598_v27 = vsub.s32 %v2038_v25, %v4512_v39 }
 0x797   :  { %v1696_v40 = vmax.f32 %v1694_v36, 0.0  ;;  %1762 = vst.msk [vmem:[#allocation8 + $0x1] sm:$0xf] %vm1761_vm10, %v1695_v38  ;;  %v3434_v36 = vld [vmem:[#allocation40] sm:$0xff]  }
 0x798   :  { %v1747_v43 = vpop.f32.mrb[24].mxu1 }
 0x799   :  { %1763 = vst.msk [vmem:[#allocation8 + $0x9] sm:$0xf] %vm1761_vm10, %v1696_v40  ;;  %v3201_v48 = vpop.f32.mrb[25].mxu1  ;;  %v1748_v47 = vadd.f32 %v1747_v43, %v1711_v42  ;;  %v3435_v43 = vld [vmem:[#allocation40 + $0x8] sm:$0xff]  }
 0x79a   :  { %v1750_v49 = vpop.f32.mrb[26].mxu1  ;;  %v3436_v48 = vld [vmem:[%s4766_s19 + $0x8] sm:$0xff]  }
 0x79b   :  { %v3202_v50 = vpop.f32.mrb[27].mxu1  ;;  %v1754_v17 = vcombine.high %v1748_v47, %v1748_v47 }
 0x79e   :  { %v1772_v51 = vld [vmem:[#allocation8 + $0x1] sm:$0xf] }
 0x79f   :  { %v1915_v53 = vld [vmem:[#allocation8 + $0x2] sm:$0xf] }
 0x7a0   :  { %v1773_v52 = vld [vmem:[#allocation8 + $0x9] sm:$0xf]  ;;  %v1764_v62 = vld [vmem:[#allocation8] sm:$0xf] }
 0x7a1   :  { %v1916_v54 = vld [vmem:[#allocation8 + $0xa] sm:$0xf]  ;;  %v2904_v55 = vpack.c.bf16 %v1773_v52, %v1772_v51 }
 0x7a2   :  { %v2916_v56 = vpack.c.bf16 %v1916_v54, %v1915_v53  ;;  %v1765_v61 = vld [vmem:[#allocation8 + $0x8] sm:$0xf]  ;;  %v3437_v53 = vld [vmem:[%s4768_s21 + $0x20] sm:$0xff]  }
 0x7a3   :  { %v1790_v58 = vrot.slane %v2904_v55, %v4515_v41  ;;  %v2908_v63 = vpack.c.bf16 %v1765_v61, %v1764_v62  ;;  %v3438_v54 = vld [vmem:[%s4768_s21 + $0x40] sm:$0xff]   ;;  %v3439_v55 = vld [vmem:[%s4768_s21 + $0x28] sm:$0xff]  }
 0x7a4   :  { %v1933_v59 = vrot.slane %v2916_v56, %v4515_v41  ;;  %v3440_v56 = vld [vmem:[%s4768_s21 + $0x48] sm:$0xff]  }
 0x7a5   :  { %3208 = vmatmul.mubr.msk.bf16.vlgmr.msra.gmra.mrb[12].mxu0 %vm1803_vm11, %v1790_v58  ;;  %v1856_v0 = vrot.slane %v2908_v63, %v4515_v41  ;;  %v3442_v58 = vld [vmem:[%s4768_s21 + $0x50] sm:$0xff]  }
 0x7a6   :  { %3224 = vmatmul.mubr.msk.bf16.vlgmr.msra.gmra.mrb[28].mxu1 %vm1803_vm11, %v1933_v59  ;;  %3212 = vmatpush3.bf16.msra.mxu0 %v3427_v57  ;;  %v3441_v57 = vld [vmem:[%s4768_s21 + $0x30] sm:$0xff]   ;;  %v3443_v59 = vld [vmem:[%s4768_s21 + $0x38] sm:$0xff]  }
 0x7a7   :  { %3215 = vmatprep.mubr.msk.bf16.mxu0 %vm3934_vm6, %v3933_v2  ;;  %3213 = vmatprep.subr.bf16.mxu0 %v3933_v2 }
 0x7a8   :  { %3231 = vmatprep.mubr.msk.bf16.mxu1 %vm3934_vm6, %v3933_v2  ;;  %3228 = vmatpush3.bf16.msra.mxu1 %v3429_v1 }
 0x7a9   :  { %3229 = vmatprep.subr.bf16.mxu1 %v3933_v2 }
 0x7aa   :  { %3214 = vmatpush3.bf16.msra.mxu0 %v3428_v60  ;;  %v3444_v60 = vld [vmem:[%s4768_s21 + $0x58] sm:$0xff]  }
 0x7ab   :  { %3243 = vmatprep.subr.bf16.mxu0 %v3933_v2 }
 0x7ac   :  { %3230 = vmatpush3.bf16.msra.mxu1 %v3431_v4 }
 0x7ad   :  { %3235 = vmatprep.subr.bf16.mxu1 %v3933_v2 }
 0x7b1   :  { %3216 = vmatmul.mubr.msk.bf16.vlgmr.msra.gmra.mrb[12].mxu0 %vm1803_vm11, %v1856_v0 }
 0x7b2   :  { %3247 = vmatprep.mubr.msk.bf16.mxu0 %vm3934_vm6, %v3933_v2  ;;  %3244 = vmatpush3.bf16.msra.mxu0 %v3430_v3 }
 0x7b3   :  { %3245 = vmatprep.subr.bf16.mxu0 %v3933_v2 }
 0x7b6   :  { %3246 = vmatpush3.bf16.msra.mxu0 %v3432_v5 }
 0x7b7   :  { %3251 = vmatprep.subr.bf16.mxu0 %v3933_v2 }
 0x879   :  { %v1983_v6 = vpop.f32.mrb[28].mxu1 }
 0x87a   :  { %v3225_v7 = vpop.f32.mrb[29].mxu1  ;;  %v1990_v9 = vcombine.high %v1983_v6, %v1983_v6 }
 0x87b   :  { %v1986_v37 = vpop.f32.mrb[30].mxu1 }
 0x87c   :  { %v3226_v44 = vpop.f32.mrb[31].mxu1 }
 0x884   :  { %v1906_v45 = vpop.f32.mrb[12].mxu0 }
 0x885   :  { %v1913_v10 = vcombine.high %v1906_v45, %v1906_v45  ;;  %v1992_v11 = vadd.f32 %v1983_v6, %v1906_v45  ;;  %v3217_v12 = vpop.f32.mrb[13].mxu0 }
 0x886   :  { %v1909_v13 = vpop.f32.mrb[14].mxu0 }
 0x887   :  { %v1993_v14 = vadd.f32 %v1990_v9, %v1913_v10  ;;  %v2001_v15 = vadd.f32 %v2920_v46, %v1992_v11  ;;  %v3218_v16 = vpop.f32.mrb[15].mxu0 }
 0x889   :  { %v2002_v18 = vadd.f32 %v2920_v46, %v1993_v14  ;;  %v2003_v19 = vadd.f32 %v2001_v15, %v1748_v47 }
 0x88b   :  { %v2004_v20 = vadd.f32 %v2002_v18, %v1754_v17  ;;  %v2005_v21 = vmax.f32 %v2003_v19, 0.0 }
 0x88d   :  { %v2006_v22 = vmax.f32 %v2004_v20, 0.0  ;;  %2011 = vst.msk [vmem:[#allocation9 + $0x1] sm:$0xf] %vm1761_vm10, %v2005_v21 }
 0x88f   :  { %2012 = vst.msk [vmem:[#allocation9 + $0x9] sm:$0xf] %vm1761_vm10, %v2006_v22 }
 0x894   :  { %v2023_v26 = vld [vmem:[#allocation9 + $0x1] ss:$2 sm:$0x3]  ;;  %v2189_v28 = vld [vmem:[#allocation9 + $0x2] ss:$2 sm:$0x3] }
 0x895   :  { %v2013_v49 = vld [vmem:[#allocation9] ss:$2 sm:$0x3] }
 0x896   :  { %v2025_v29 = vld [vmem:[#allocation9 + $0x9] ss:$2 sm:$0x3]  ;;  %v2191_v30 = vld [vmem:[#allocation9 + $0xa] ss:$2 sm:$0x3] }
 0x897   :  { %v2925_v31 = vpack.c.bf16 %v2025_v29, %v2023_v26  ;;  %v2937_v32 = vpack.c.bf16 %v2191_v30, %v2189_v28  ;;  %v2015_v39 = vld [vmem:[#allocation9 + $0x8] ss:$2 sm:$0x3]  ;;  %v3446_v26 = vld [vmem:[%s4768_s21 + $0x8] sm:$0xff]   ;;  %v3447_v29 = vld [vmem:[%s4768_s21 + $0x10] sm:$0xff]  }
 0x898   :  { %v2929_v50 = vpack.c.bf16 %v2015_v39, %v2013_v49 }
 0x899   :  { %v2042_v33 = vrot.slane %v2925_v31, %v4598_v27  ;;  %v2208_v34 = vrot.slane %v2937_v32, %v4598_v27  ;;  %v3448_v32 = vld [vmem:[%s4768_s21 + $0x18] sm:$0xff]  }
 0x89a   :  { %v2114_v51 = vrot.slane %v2929_v50, %v4598_v27  ;;  %v2736_v50 = vld [vmem:[%s4772_s25 + $0x30] sm:$0xff] }
 0x89b   :  { %v2049_v38 = vrot.slane %v2042_v33, %v4598_v27  ;;  %v2215_v40 = vrot.slane %v2208_v34, %v4598_v27 }
 0x89c   :  { %v2121_v52 = vrot.slane %v2114_v51, %v4598_v27  ;;  %v2737_v51 = vld [vmem:[%s4772_s25 + $0x38] sm:$0xff] }
 0x89d   :  { %3232 = vmatmul.mubr.msk.bf16.vlgmr.msra.gmra.mrb[32].mxu1 %vm1803_vm11, %v2049_v38  ;;  %3248 = vmatmul.mubr.msk.bf16.vlgmr.msra.gmra.mrb[16].mxu0 %vm1803_vm11, %v2215_v40  ;;  %v3937_v40 = vmov 0.0|0.0  }
 0x89e   :  { %3236 = vmatpush3.bf16.msra.mxu1 %v3433_v35  ;;  %3252 = vmatpush3.bf16.msra.mxu0 %v3434_v36  ;;  %v2730_v35 = vld [vmem:[%s4772_s25] sm:$0xff]  ;;  %v2731_v36 = vld [vmem:[%s4772_s25 + $0x8] sm:$0xff] }
 0x89f   :  { %3253 = vmatprep.subr.bf16.mxu0 %v3933_v2  ;;  %3237 = vmatprep.subr.bf16.mxu1 %v3933_v2 }
 0x8a0   :  { %3255 = vmatprep.mubr.msk.bf16.mxu0 %vm3934_vm6, %v3933_v2  ;;  %3239 = vmatprep.mubr.msk.bf16.mxu1 %vm3934_vm6, %v3933_v2 }
 0x8a2   :  { %3254 = vmatpush3.bf16.msra.mxu0 %v3435_v43  ;;  %3238 = vmatpush3.bf16.msra.mxu1 %v3436_v48  ;;  %v2734_v43 = vld [vmem:[%s4772_s25 + $0x20] sm:$0xff]  ;;  %v2735_v48 = vld [vmem:[%s4772_s25 + $0x28] sm:$0xff] }
 0x8a3   :  { %3259 = vmatprep.subr.bf16.mxu1 %v3933_v2  ;;  %3283 = vmatprep.subr.bf16.mxu0 %v3933_v2  ;;  %v3321_v49 = vpack.c.bf16 %v2735_v48, %v2734_v43 }
 0x8a5   :  { %3256 = vmatmul.mubr.msk.bf16.vlgmr.msra.gmra.mrb[20].mxu0 %vm1803_vm11, %v2049_v38  ;;  %v3315_v38 = vpack.c.bf16 %v2731_v36, %v2730_v35 }
 0x8a6   :  { %3291 = vmatprep.mubr.msk.bf16.mxu0 %vm3934_vm6, %v3933_v2  ;;  %3284 = vmatpush3.bf16.msra.mxu0 %v3438_v54 }
 0x8a7   :  { %3285 = vmatprep.subr.bf16.mxu0 %v3933_v2 }
 0x8a9   :  { %3240 = vmatmul.mubr.msk.bf16.vlgmr.msra.gmra.mrb[32].mxu1 %vm1803_vm11, %v2121_v52  ;;  %v3324_v52 = vpack.c.bf16 %v2737_v51, %v2736_v50 }
 0x8aa   :  { %3267 = vmatprep.mubr.msk.bf16.mxu1 %vm3934_vm6, %v3933_v2  ;;  %3260 = vmatpush3.bf16.msra.mxu1 %v3437_v53 }
 0x8ab   :  { %3261 = vmatprep.subr.bf16.mxu1 %v3933_v2  ;;  %3286 = vmatpush3.bf16.msra.mxu0 %v3440_v56 }
 0x8ac   :  { %3287 = vmatprep.subr.bf16.mxu0 %v3933_v2 }
 0x8ae   :  { %3262 = vmatpush3.bf16.msra.mxu1 %v3439_v55 }
 0x8af   :  { %3263 = vmatprep.subr.bf16.mxu1 %v3933_v2  ;;  %3288 = vmatpush3.bf16.msra.mxu0 %v3442_v58 }
 0x8b0   :  { %3289 = vmatprep.subr.bf16.mxu0 %v3933_v2 }
 0x8b2   :  { %3264 = vmatpush3.bf16.msra.mxu1 %v3441_v57  ;;  %v2942_v57 = vld [vmem:[%s4814_s7] ss:$0 sm:$0xff] }
 0x8b3   :  { %3265 = vmatprep.subr.bf16.mxu1 %v3933_v2  ;;  %3290 = vmatpush3.bf16.msra.mxu0 %v3444_v60  ;;  %v2317_v58 = vcombine.low %v2942_v57, %v2942_v57 }
 0x8b4   :  { %3314 = vmatprep.subr.bf16.mxu0 %v3937_v40 }
 0x8b6   :  { %3266 = vmatpush3.bf16.msra.mxu1 %v3443_v59  ;;  %v2324_v59 = vrot.slane %v2317_v58, %v4515_v41 }
 0x8b7   :  { %3271 = vmatprep.subr.bf16.mxu1 %v3933_v2 }
 0x970   :  { %v2265_v61 = vpop.f32.mrb[16].mxu0 }
 0x971   :  { %v3249_v62 = vpop.f32.mrb[17].mxu0  ;;  %v2278_v5 = vrot.slane %v2265_v61, %v4515_v41 }
 0x972   :  { %v2268_v63 = vpop.f32.mrb[18].mxu0 }
 0x973   :  { %v3250_v0 = vpop.f32.mrb[19].mxu0  ;;  %v2279_v45 = vcombine.high %v2278_v5, %v2278_v5 }
 0x978   :  { %v4663_v1 = vpop.f32.mrb[20].mxu0 }
 0x979   :  { %v3257_v3 = vpop.f32.mrb[21].mxu0  ;;  %v2361_v60 = vadd.f32 %v4663_v1, %v2324_v59 }
 0x97a   :  { %v2363_v4 = vpop.f32.mrb[22].mxu0  ;;  %v2980_v3 = vld [vmem:[#allocation38] ss:$0 sm:$0xff] }
 0x97b   :  { %v3258_v6 = vpop.f32.mrb[23].mxu0 }
 0x97c   :  { %v2171_v7 = vpop.f32.mrb[32].mxu1 }
 0x97d   :  { %v2184_v37 = vrot.slane %v2171_v7, %v4515_v41  ;;  %v3241_v44 = vpop.f32.mrb[33].mxu1 }
 0x97e   :  { %v2174_v42 = vpop.f32.mrb[34].mxu1 }
 0x97f   :  { %v2185_v46 = vcombine.high %v2184_v37, %v2184_v37  ;;  %v2282_v47 = vadd.f32 %v2278_v5, %v2184_v37  ;;  %v3242_v9 = vpop.f32.mrb[35].mxu1  ;;  %v2373_v5 = vrot.slane %v2361_v60, %v4515_v41 }
 0x981   :  { %v2283_v10 = vadd.f32 %v2279_v45, %v2185_v46  ;;  %v2291_v11 = vadd.f32 %v2941_v8, %v2282_v47  ;;  %v2374_v45 = vcombine.high %v2373_v5, %v2373_v5 }
 0x983   :  { %v2292_v12 = vadd.f32 %v2941_v8, %v2283_v10  ;;  %v2293_v13 = vmax.f32 %v2291_v11, 0.0 }
 0x985   :  { %v2294_v14 = vmax.f32 %v2292_v12, 0.0  ;;  %2383 = vst.msk [vmem:[#allocation10 + $0x1] sm:$0x3] %vm2382_vm13, %v2293_v13 }
 0x987   :  { %2384 = vst.msk [vmem:[#allocation10 + $0x5] sm:$0x3] %vm2382_vm13, %v2294_v14 }
 0x98c   :  { %v2397_v15 = vld [vmem:[#allocation10 + $0x1] sm:$0x3] }
 0x98d   :  { %v2590_v17 = vld [vmem:[#allocation10 + $0x2] sm:$0x3]  ;;  %v2385_v30 = vld [vmem:[#allocation10] sm:$0x3] }
 0x98e   :  { %v2398_v16 = vld [vmem:[#allocation10 + $0x5] sm:$0x3] }
 0x98f   :  { %v2591_v18 = vld [vmem:[#allocation10 + $0x6] sm:$0x3]  ;;  %v2954_v19 = vpack.c.bf16 %v2398_v16, %v2397_v15  ;;  %v2386_v28 = vld [vmem:[#allocation10 + $0x4] sm:$0x3] }
 0x990   :  { %v2974_v20 = vpack.c.bf16 %v2591_v18, %v2590_v17  ;;  %v2960_v31 = vpack.c.bf16 %v2386_v28, %v2385_v30  ;;  %v2981_v28 = vld [vmem:[%s4815_s13] ss:$0 sm:$0xff] }
 0x991   :  { %v2419_v21 = vrot.slane %v2954_v19, %v4598_v27 }
 0x992   :  { %v2612_v22 = vrot.slane %v2974_v20, %v4598_v27  ;;  %v2504_v33 = vrot.slane %v2960_v31, %v4598_v27 }
 0x993   :  { %v2426_v24 = vrot.slane %v2419_v21, %v4598_v27 }
 0x994   :  { %v2619_v25 = vrot.slane %v2612_v22, %v4598_v27  ;;  %v2511_v34 = vrot.slane %v2504_v33, %v4598_v27  ;;  %v2733_v27 = vld [vmem:[%s4772_s25 + $0x18] sm:$0xff] }
 0x995   :  { %3268 = vmatmul.mubr.msk.bf16.vlgmr.msra.gmra.mrb[36].mxu1 %vm2451_vm14, %v2426_v24 }
 0x996   :  { %3292 = vmatmul.mubr.msk.bf16.vlgmr.msra.gmra.mrb[24].mxu0 %vm2451_vm14, %v2619_v25  ;;  %3272 = vmatpush3.bf16.msra.mxu1 %v3445_v23 }
 0x997   :  { %3279 = vmatprep.mubr.msk.bf16.mxu1 %vm3934_vm6, %v3933_v2  ;;  %3273 = vmatprep.subr.bf16.mxu1 %v3933_v2 }
 0x998   :  { %3311 = vmatprep.mubr.msk.f32.mxu0 %vm3934_vm6, %v3933_v2  ;;  %3316 = vmatpush3.bf16.msra.mxu0 %v3315_v38 }
 0x999   :  { %3317 = vmatprep.subr.bf16.mxu0 %v3937_v40 }
 0x99a   :  { %3274 = vmatpush3.bf16.msra.mxu1 %v3446_v26 }
 0x99b   :  { %3275 = vmatprep.subr.bf16.mxu1 %v3933_v2 }
 0x99e   :  { %3276 = vmatpush3.bf16.msra.mxu1 %v3447_v29 }
 0x99f   :  { %3277 = vmatprep.subr.bf16.mxu1 %v3933_v2  ;;  %v2732_v2 = vld [vmem:[%s4772_s25 + $0x10] sm:$0xff] }
 0x9a0   :  { %v3318_v39 = vpack.c.bf16 %v2733_v27, %v2732_v2 }
 0x9a2   :  { %3278 = vmatpush3.bf16.msra.mxu1 %v3448_v32  ;;  %3319 = vmatpush3.bf16.msra.mxu0 %v3318_v39 }
 0x9a3   :  { %3320 = vmatprep.subr.bf16.mxu0 %v3937_v40 }
 0x9a5   :  { %3280 = vmatmul.mubr.msk.bf16.vlgmr.msra.gmra.mrb[36].mxu1 %vm2451_vm14, %v2511_v34 }
 0x9a6   :  { %3322 = vmatpush3.bf16.msra.mxu0 %v3321_v49 }
 0x9a7   :  { %3323 = vmatprep.subr.bf16.mxu0 %v3937_v40 }
 0x9aa   :  { %3325 = vmatpush3.bf16.msra.mxu0 %v3324_v52 }
 0xa69   :  { %v2681_v53 = vpop.f32.mrb[24].mxu0 }
 0xa6a   :  { %v3293_v54 = vpop.f32.mrb[25].mxu0  ;;  %v2694_v61 = vrot.slane %v2681_v53, %v4515_v41 }
 0xa6b   :  { %v2684_v55 = vpop.f32.mrb[26].mxu0 }
 0xa6c   :  { %v3294_v56 = vpop.f32.mrb[27].mxu0  ;;  %v2695_v6 = vcombine.high %v2694_v61, %v2694_v61 }
 0xa78   :  { %v2573_v62 = vpop.f32.mrb[36].mxu1 }
 0xa79   :  { %v2586_v63 = vrot.slane %v2573_v62, %v4515_v41  ;;  %v3281_v0 = vpop.f32.mrb[37].mxu1 }
 0xa7a   :  { %v2576_v4 = vpop.f32.mrb[38].mxu1 }
 0xa7b   :  { %v2587_v7 = vcombine.high %v2586_v63, %v2586_v63  ;;  %v2698_v37 = vadd.f32 %v2694_v61, %v2586_v63  ;;  %v3282_v44 = vpop.f32.mrb[39].mxu1 }
 0xa7d   :  { %v2699_v8 = vadd.f32 %v2695_v6, %v2587_v7  ;;  %v2707_v42 = vadd.f32 %v2980_v3, %v2698_v37 }
 0xa7f   :  { %v2708_v46 = vadd.f32 %v2980_v3, %v2699_v8  ;;  %v2709_v47 = vadd.f32 %v2707_v42, %v2373_v5 }
 0xa81   :  { %v2710_v1 = vadd.f32 %v2708_v46, %v2374_v45  ;;  %v2711_v9 = vmax.f32 %v2709_v47, 0.0 }
 0xa83   :  { %v2712_v10 = vmax.f32 %v2710_v1, 0.0  ;;  %v2713_v11 = vsel %vm2382_vm13, %v2711_v9, 0.0 }
 0xa84   :  { %v2714_v12 = vrot.slane %v2713_v11, 4 }
 0xa85   :  { %v2720_v13 = vsel %vm2382_vm13, %v2712_v10, 0.0 }
 0xa86   :  { %v2715_v14 = vadd.f32 %v2714_v12, %v2713_v11  ;;  %v2721_v15 = vrot.slane %v2720_v13, 4 }
 0xa88   :  { %v2716_v41 = vrot.slane %v2715_v14, 2  ;;  %v2722_v16 = vadd.f32 %v2721_v15, %v2720_v13 }
 0xa8a   :  { %v2717_v17 = vadd.f32 %v2716_v41, %v2715_v14  ;;  %v2723_v18 = vrot.slane %v2722_v16, 2 }
 0xa8c   :  { %v2718_v19 = vrot.slane %v2717_v17, 1  ;;  %v2724_v20 = vadd.f32 %v2723_v18, %v2722_v16 }
 0xa8e   :  { %v2719_v21 = vadd.f32 %v2718_v19, %v2717_v17  ;;  %v2725_v22 = vrot.slane %v2724_v20, 1 }
 0xa90   :  { %v2726_v23 = vadd.f32 %v2725_v22, %v2724_v20  ;;  %v2728_v24 = vmul.f32 0.5, %v2719_v21 }
 0xa92   :  { %v2729_v25 = vmul.f32 0.5, %v2726_v23 }
 0xa94   :  { %v2748_v26 = vsel %vm2747_vm15, %v2729_v25, %v2728_v24 }
 0xa95   :  { %3312 = vmatmul.mubr.msk.f32.vlgmr.msra.gmra.mrb[28].mxu0 %vm2451_vm14, %v2748_v26 }
 0xb68   :  { %v2817_v29 = vpop.f32.mrb[28].mxu0 }
 0xb69   :  { %v2818_v30 = vadd.f32 %v2981_v28, %v2817_v29  ;;  %v3313_v31 = vpop.f32.mrb[29].mxu0 }
 0xb6b   :  { %2822 = vst.msk [vmem:[#allocation41] sm:$0x3] %vm2821_vm0, %v2818_v30 }
 0xb6c   :  { %3878 = shalt.err (!%p3875_p2)
}
 0xb6d   :  { %s4816_s29 = sld [smem:[#allocation67_spill]] }
 0xb73   :  { %s3879_s23 = scalar_lea.hbm %s4816_s29, 32 }
 0xb74   :  { %p3880_p3 = scmp.ne.s32.totalorder %s4816_s29, %s3879_s23  ;;  %p3883_p4 = scmp.lt.u32.totalorder %s3879_s23, %s4816_s29 }
 0xb76   :  { %p3885_p5 = pnand %p3883_p4, %p3880_p3 }
 0xb78   :  { %3888 = shalt.err (!%p3885_p5)
}
 0xb79   :  { %2832 = dma.vmem_to_hbm [thread:$0]  %s2830_s14, 32, %s4816_s29, [#allocation13]  }
 0xb7a   :  { %3909 = dma.done.wait [#allocation13], 32  }
 0xb7b   :  { %3910 = vsyncadd [#allocation13], 4294967264 }
 0xb7c   :  { %2836 = vsyncpa [#allocation12], 1 }
 0xb7d   :  { %2837 = vsyncpa [#allocation15], 1 }
 0xb7e   :  { %2838 = vsyncpa [#allocation18], 1 }
 0xb7f   :  { %2839 = vsyncpa [#allocation21], 1 }
 0xb80   :  { %2840 = vsyncpa [#allocation24], 1 }
 0xb81   :  { %2841 = vsyncpa [#allocation27], 1 }
 0xb82   :  { %2842 = vsyncpa [#allocation30], 1 }
 0xb83   :  { %2843 = vsyncpa [#allocation33], 1 }
 0xb84   :  { %2844 = vsyncpa [#allocation36], 1 }
 0xb85   :  { %2845 = vsyncpa [#allocation39], 1 }
 0xb86   :  { %2846 = vsyncpa [#allocation13], 1 }

</bundles_post_ra>
